<compile_context>
chip_gen: v7x
topology: tpu7x:2x2x1
jax: 0.10.0
libtpu: 0.0.40
codegen_flags: <defaults>
</compile_context>

<pallas_src>
import jax
import jax.numpy as jnp
from jax import lax
from jax.experimental import pallas as pl
from jax.experimental.pallas import tpu as pltpu


# ----------------------------------------------------------------------------
# Pallas kernel: 3x3 SAME conv (bias-free) + folded BatchNorm(eval) + ReLU.
# One grid step = one image.  Lane-dense in/out, 3 MXU matmuls (one per dy tap).
# ----------------------------------------------------------------------------
def conv3x3_bn_relu_kernel(x_ref, w_ref, b_ref, o_ref):
    # x_ref: (1, H+2, (W+2)*Cin)   zero-padded input, (W,Cin) flattened onto lanes
    # w_ref: (3, (W+2)*Cin, W*Cout) banded weights (dx taps + BN scale folded in)
    # b_ref: (1, W*Cout)            folded BN bias, tiled along W
    # o_ref: (1, H, W*Cout)         lane-dense output
    H = o_ref.shape[1]
    wc = o_ref.shape[2]

    x = x_ref[0]                                            # (H+2, (W+2)*Cin)
    # accumulator starts at the folded BN bias (broadcast over rows)
    acc = jnp.broadcast_to(b_ref[...], (H, wc)).astype(jnp.float32)
    # 3 dy taps: each is a sublane-offset row slab, no reshapes / lane shuffles
    for dy in range(3):
        acc = acc + jnp.dot(x[dy:dy + H, :], w_ref[dy],
                            preferred_element_type=jnp.float32)
    o_ref[0] = jnp.maximum(acc, 0.0).astype(o_ref.dtype)    # ReLU only epilogue


def conv_layer_pallas(x_nhwc, p, eps=1e-5):
    """ConvLayer forward (NHWC): Conv3x3(SAME, no bias) + BatchNorm(eval) + ReLU."""
    N, H, W, Cin = x_nhwc.shape
    Cout = p["w"].shape[0]

    # Fold eval-mode BatchNorm: scale into the conv weights, bias as a vector.
    scale = p["gamma"] * lax.rsqrt(p["var"] + eps)
    bias = p["beta"] - p["mean"] * scale
    w_hwio = jnp.transpose(p["w"], (2, 3, 1, 0)) * scale     # OIHW -> HWIO, scaled

    # Banded lane->lane weights: fold the 3 dx taps of each dy row into one
    # ((W+2)*Cin, W*Cout) matrix: Wb[dy, p*Cin+ci, w*Cout+co] = w[dy, p-w, ci, co].
    sel = (jnp.arange(W + 2)[None, :, None]
           == jnp.arange(W)[None, None, :] + jnp.arange(3)[:, None, None])
    w_band = jnp.einsum("xpw,yxio->ypiwo", sel.astype(w_hwio.dtype), w_hwio)
    w_band = w_band.reshape(3, (W + 2) * Cin, W * Cout)
    bias_lane = jnp.tile(bias, (W,)).reshape(1, W * Cout)

    # Lane-dense input slab: SAME padding, then flatten (W+2, Cin) onto the lane axis
    # (contiguous reshape in NHWC -> free).
    x_pad = jnp.pad(x_nhwc, ((0, 0), (1, 1), (1, 1), (0, 0)))
    x_slab = x_pad.reshape(N, H + 2, (W + 2) * Cin)

    out_slab = pl.pallas_call(
        conv3x3_bn_relu_kernel,
        out_shape=jax.ShapeDtypeStruct((N, H, W * Cout), jnp.float32),
        grid_spec=pltpu.PrefetchScalarGridSpec(
            num_scalar_prefetch=0,
            grid=(N,),
            in_specs=[
                pl.BlockSpec((1, H + 2, (W + 2) * Cin), lambda n: (n, 0, 0)),
                pl.BlockSpec((3, (W + 2) * Cin, W * Cout), lambda n: (0, 0, 0)),
                pl.BlockSpec((1, W * Cout), lambda n: (0, 0)),
            ],
            out_specs=pl.BlockSpec((1, H, W * Cout), lambda n: (n, 0, 0)),
        ),
        compiler_params=pltpu.CompilerParams(
            dimension_semantics=("parallel",)),
    )(x_slab, w_band, bias_lane)

    # (N, H, W*Cout) -> (N, H, W, Cout): contiguous reshape in NHWC (free).
    return out_slab.reshape(N, H, W, Cout)


# ----------------------------------------------------------------------------
# Pool / unpool glue (NHWC, PyTorch-style flat H*W indices). Reshape-based, no scatter.
# ----------------------------------------------------------------------------
def max_pool2x2_nhwc(x):
    N, H, W, C = x.shape
    Hp, Wp = H // 2, W // 2
    xw = x.reshape(N, Hp, 2, Wp, 2, C).transpose(0, 1, 3, 5, 2, 4)
    xw = xw.reshape(N, Hp, Wp, C, 4)                         # window row-major (dy,dx)
    vals = xw.max(axis=-1)
    sub = jnp.argmax(xw, axis=-1).astype(jnp.int32)          # 0..3
    dy, dx = sub // 2, sub % 2
    base = (jnp.arange(Hp, dtype=jnp.int32)[:, None] * 2 * W
            + jnp.arange(Wp, dtype=jnp.int32)[None, :] * 2)
    idx = base[None, :, :, None] + dy * W + dx               # flat index into (H, W)
    return vals, idx.astype(jnp.int32)


def max_unpool2x2_nhwc(x, indices):
    """MaxUnpool2d(2,2): one-hot write into the (2,2) window (indices from a 2x2 pool)."""
    N, H, W, C = x.shape
    Ho, Wo = 2 * H, 2 * W
    base = (jnp.arange(H, dtype=jnp.int32)[:, None] * 2 * Wo
            + jnp.arange(W, dtype=jnp.int32)[None, :] * 2)
    local = indices - base[None, :, :, None]                 # in {0, 1, Wo, Wo+1}
    dy = local // Wo
    dx = local - dy * Wo
    sub = dy * 2 + dx                                        # 0..3
    onehot = (sub[..., None] == jnp.arange(4, dtype=jnp.int32)).astype(x.dtype)
    out = (x[..., None] * onehot).reshape(N, H, W, C, 2, 2)
    out = out.transpose(0, 1, 4, 2, 5, 3).reshape(N, Ho, Wo, C)
    return out


# ----------------------------------------------------------------------------
# SharedNet forward (Pallas path).  Internally NHWC; returned tensors are NCHW
# to match the PyTorch module's convention.
# ----------------------------------------------------------------------------
def sharednet_forward(x_nchw, params):
    to_nchw = lambda t: jnp.transpose(t, (0, 3, 1, 2))
    logits = jnp.transpose(x_nchw, (0, 2, 3, 1))             # NCHW -> NHWC once

    # ---- encoder ----
    enc_layer, down_layer, down_indices, enc_out = [], [], [], []
    for i in range(len(params["down_blocks"])):
        for lp in params["enc_blocks"][i]:
            logits = conv_layer_pallas(logits, lp)
        enc_layer.append(logits)
        down = conv_layer_pallas(logits, params["down_blocks"][i])
        pooled, idx = max_pool2x2_nhwc(down)
        down_layer.append(down)
        enc_out.append(pooled)
        down_indices.append(idx)
        logits = pooled

    # ---- decoder ----
    up_layer, dec_layer = [], []
    for i in range(len(params["up_blocks"])):
        up = max_unpool2x2_nhwc(logits, down_indices[-(i + 1)])
        up_layer.append(up)
        logits = conv_layer_pallas(up, params["up_blocks"][i])
        for lp in params["dec_blocks"][i]:
            logits = conv_layer_pallas(logits, lp)
        dec_layer.append(logits)

    # ---- convert returned tensors to NCHW (PyTorch convention) ----
    enc_dict = {"out": [to_nchw(t) for t in enc_layer],
                "down": [to_nchw(t) for t in down_layer]}
    dec_out_nchw = [to_nchw(t) for t in dec_layer]
    dec_dict = {"out": dec_out_nchw, "up": [to_nchw(t) for t in up_layer]}
    down_indices_nchw = [to_nchw(t) for t in down_indices]
    out_dict = {"enc": [to_nchw(t) for t in enc_out], "dec": dec_out_nchw}
    return enc_dict, dec_dict, down_indices_nchw, out_dict


# ----------------------------------------------------------------------------
# Parameter construction (deterministic, synthetic — eval-mode BN running stats).
# ----------------------------------------------------------------------------
def make_convlayer_params(key, cin, cout):
    kw, kg, kb, km, kv = jax.random.split(key, 5)
    return {
        "w": jax.random.normal(kw, (cout, cin, 3, 3), jnp.float32) / (3.0 * (cin ** 0.5)),
        "gamma": jax.random.uniform(kg, (cout,), jnp.float32, 0.5, 1.5),
        "beta": jax.random.normal(kb, (cout,), jnp.float32) * 0.1,
        "mean": jax.random.normal(km, (cout,), jnp.float32) * 0.1,
        "var": jax.random.uniform(kv, (cout,), jnp.float32, 0.5, 1.5),
    }


def build_sharednet_params(key, filters, mid_layers=0):
    params = {"enc_blocks": [], "down_blocks": [], "up_blocks": [], "dec_blocks": []}
    counter = [0]

    def nxt():
        counter[0] += 1
        return jax.random.fold_in(key, counter[0])

    # encoder
    for i, f in enumerate(filters):
        cin = 3 if i == 0 else filters[i - 1]
        block = [make_convlayer_params(nxt(), cin, f)]
        block += [make_convlayer_params(nxt(), f, f) for _ in range(mid_layers)]
        params["enc_blocks"].append(block)
        params["down_blocks"].append(make_convlayer_params(nxt(), f, f))

    # decoder (reversed filter list, last up-block keeps the channel count)
    fr = list(reversed(filters))
    for i in range(len(fr)):
        cin = fr[i]
        cout = fr[i + 1] if i + 1 < len(fr) else fr[-1]
        params["up_blocks"].append(make_convlayer_params(nxt(), cin, cout))
        block = [make_convlayer_params(nxt(), cout, cout)]
        block += [make_convlayer_params(nxt(), cout, cout) for _ in range(mid_layers)]
        params["dec_blocks"].append(block)
    return params


# ----------------------------------------------------------------------------
# Pure-JAX NCHW reference (for correctness checks).
# ----------------------------------------------------------------------------
def reference_conv_layer(x, p, eps=1e-5):
    y = lax.conv_general_dilated(x, p["w"], (1, 1), "SAME",
                                 dimension_numbers=("NCHW", "OIHW", "NCHW"))
    scale = p["gamma"] / jnp.sqrt(p["var"] + eps)
    bias = p["beta"] - p["mean"] * scale
    return jnp.maximum(y * scale[None, :, None, None] + bias[None, :, None, None], 0.0)


def reference_maxpool(x):
    N, C, H, W = x.shape
    xw = x.reshape(N, C, H // 2, 2, W // 2, 2).transpose(0, 1, 2, 4, 3, 5)
    xw = xw.reshape(N, C, H // 2, W // 2, 4)
    vals = xw.max(-1)
    sub = jnp.argmax(xw, -1).astype(jnp.int32)
    dy, dx = sub // 2, sub % 2
    base = (jnp.arange(H // 2, dtype=jnp.int32)[:, None] * 2 * W
            + jnp.arange(W // 2, dtype=jnp.int32)[None, :] * 2)
    return vals, (base[None, None] + dy * W + dx).astype(jnp.int32)


def reference_unpool(x, idx):
    N, C, H, W = x.shape
    Ho, Wo = 2 * H, 2 * W
    out = jnp.zeros((N * C, Ho * Wo), x.dtype)
    out = out.at[jnp.arange(N * C)[:, None], idx.reshape(N * C, -1)].set(x.reshape(N * C, -1))
    return out.reshape(N, C, Ho, Wo)


def reference_encoder(x, params):
    enc_layer, down_layer, down_indices, enc_out = [], [], [], []
    logits = x
    for i in range(len(params["down_blocks"])):
        for lp in params["enc_blocks"][i]:
            logits = reference_conv_layer(logits, lp)
        enc_layer.append(logits)
        down = reference_conv_layer(logits, params["down_blocks"][i])
        pooled, idx = reference_maxpool(down)
        down_layer.append(down)
        enc_out.append(pooled)
        down_indices.append(idx)
        logits = pooled
    return logits, enc_layer, down_layer, down_indices, enc_out


def reference_decoder(logits, down_indices, params):
    up_layer, dec_layer = [], []
    for i in range(len(params["up_blocks"])):
        up = reference_unpool(logits, down_indices[-(i + 1)])
        up_layer.append(up)
        logits = reference_conv_layer(up, params["up_blocks"][i])
        for lp in params["dec_blocks"][i]:
            logits = reference_conv_layer(logits, lp)
        dec_layer.append(logits)
    return up_layer, dec_layer


# ----------------------------------------------------------------------------
if __name__ == "__main__":
    key = jax.random.PRNGKey(0)
    filters = [4, 8]
    mid_layers = 0
    N, H, W = 2, 16, 16

    x = jax.random.normal(jax.random.fold_in(key, 12345), (N, 3, H, W), jnp.float32)
    params = build_sharednet_params(key, filters, mid_layers)

    fwd = jax.jit(sharednet_forward)
    enc_dict, dec_dict, down_indices, out_dict = fwd(x, params)
    jax.block_until_ready((enc_dict, dec_dict, down_indices, out_dict))

    def check(a, b, name):
        assert a.shape == b.shape, f"shape mismatch: {name} {a.shape} vs {b.shape}"
        err = float(jnp.max(jnp.abs(a - b)))
        assert jnp.allclose(a, b, atol=1e-4, rtol=1e-4), f"mismatch {name}: max|diff|={err}"

    # --- encoder correctness (independent pure-JAX reference) ---
    _, ref_enc_layer, ref_down_layer, _, ref_enc_out = reference_encoder(x, params)
    for i, (a, b) in enumerate(zip(enc_dict["out"], ref_enc_layer)):
        check(a, b, f"enc.out[{i}]")
    for i, (a, b) in enumerate(zip(enc_dict["down"], ref_down_layer)):
        check(a, b, f"enc.down[{i}]")
    for i, (a, b) in enumerate(zip(out_dict["enc"], ref_enc_out)):
        check(a, b, f"out.enc[{i}]")

    # --- decoder correctness: reference decoder fed the pipeline's pooled logits and
    #     indices (indices are not compared bit-exactly because argmax tie-breaking on
    #     near-equal values may differ under f32 rounding between conv implementations).
    ref_up, ref_dec = reference_decoder(out_dict["enc"][-1], down_indices, params)
    for i, (a, b) in enumerate(zip(dec_dict["up"], ref_up)):
        check(a, b, f"dec.up[{i}]")
    for i, (a, b) in enumerate(zip(dec_dict["out"], ref_dec)):
        check(a, b, f"dec.out[{i}]")

    assert dec_dict["out"][-1].shape == (N, filters[0], H, W)
    assert down_indices[0].shape == (N, filters[0], H // 2, W // 2)

    print("KERNEL_OK")
</pallas_src>

<mosaic_0001>
module attributes {stable_mosaic.version = 11 : i64} {
  func.func @conv3x3_bn_relu_kernel(%arg0: i32, %arg1: memref<1x18x54xf32, #tpu.memory_space<vmem>>, %arg2: memref<3x54x64xf32, #tpu.memory_space<vmem>>, %arg3: memref<1x64xf32, #tpu.memory_space<vmem>>, %arg4: memref<1x16x64xf32, #tpu.memory_space<vmem>>) attributes {dimension_semantics = [#tpu.dimension_semantics<parallel>], iteration_bounds = array<i64: 2>, scalar_prefetch = 0 : i64, scratch_operands = 0 : i64, tpu.core_type = #tpu.core_type<tc>, window_params = [{transform_indices = @transform_0, window_bounds = array<i64: 1, 18, 54>}, {pipeline_mode = #tpu.pipeline_mode<synchronous>, transform_indices = @transform_1, window_bounds = array<i64: 3, 54, 64>}, {pipeline_mode = #tpu.pipeline_mode<synchronous>, transform_indices = @transform_2, window_bounds = array<i64: 1, 64>}, {transform_indices = @transform_3, window_bounds = array<i64: 1, 16, 64>}]} {
    %c0 = arith.constant 0 : index
    %c0_0 = arith.constant 0 : index
    %c0_1 = arith.constant 0 : index
    %0 = vector.load %arg1[%c0, %c0_0, %c0_1] : memref<1x18x54xf32, #tpu.memory_space<vmem>>, vector<1x18x54xf32>
    %1 = vector.shape_cast %0 : vector<1x18x54xf32> to vector<18x54xf32>
    %c0_2 = arith.constant 0 : index
    %c0_3 = arith.constant 0 : index
    %2 = vector.load %arg3[%c0_2, %c0_3] : memref<1x64xf32, #tpu.memory_space<vmem>>, vector<1x64xf32>
    %3 = vector.shape_cast %2 : vector<1x64xf32> to vector<1x64xf32>
    %4 = vector.broadcast %3 : vector<1x64xf32> to vector<16x64xf32>
    %5 = vector.extract_strided_slice %1 {offsets = [0, 0], sizes = [16, 54], strides = [1, 1]} : vector<18x54xf32> to vector<16x54xf32>
    %c0_4 = arith.constant 0 : index
    %c0_5 = arith.constant 0 : index
    %c0_6 = arith.constant 0 : index
    %6 = vector.load %arg2[%c0_4, %c0_5, %c0_6] : memref<3x54x64xf32, #tpu.memory_space<vmem>>, vector<1x54x64xf32>
    %7 = vector.shape_cast %6 : vector<1x54x64xf32> to vector<54x64xf32>
    %cst = arith.constant dense<0.000000e+00> : vector<16x64xf32>
    %8 = tpu.matmul %5, %7, %cst {dimension_numbers = #tpu.dot_dimension_numbers<[1], [0], [0], [1], [0, 0, 1, 1], [], []>} : vector<16x54xf32>, vector<54x64xf32>, vector<16x64xf32> -> vector<16x64xf32>
    %9 = arith.addf %4, %8 : vector<16x64xf32>
    %10 = vector.extract_strided_slice %1 {offsets = [1, 0], sizes = [16, 54], strides = [1, 1]} : vector<18x54xf32> to vector<16x54xf32>
    %c1 = arith.constant 1 : index
    %c0_7 = arith.constant 0 : index
    %c0_8 = arith.constant 0 : index
    %11 = vector.load %arg2[%c1, %c0_7, %c0_8] : memref<3x54x64xf32, #tpu.memory_space<vmem>>, vector<1x54x64xf32>
    %12 = vector.shape_cast %11 : vector<1x54x64xf32> to vector<54x64xf32>
    %cst_9 = arith.constant dense<0.000000e+00> : vector<16x64xf32>
    %13 = tpu.matmul %10, %12, %cst_9 {dimension_numbers = #tpu.dot_dimension_numbers<[1], [0], [0], [1], [0, 0, 1, 1], [], []>} : vector<16x54xf32>, vector<54x64xf32>, vector<16x64xf32> -> vector<16x64xf32>
    %14 = arith.addf %9, %13 : vector<16x64xf32>
    %15 = vector.extract_strided_slice %1 {offsets = [2, 0], sizes = [16, 54], strides = [1, 1]} : vector<18x54xf32> to vector<16x54xf32>
    %c2 = arith.constant 2 : index
    %c0_10 = arith.constant 0 : index
    %c0_11 = arith.constant 0 : index
    %16 = vector.load %arg2[%c2, %c0_10, %c0_11] : memref<3x54x64xf32, #tpu.memory_space<vmem>>, vector<1x54x64xf32>
    %17 = vector.shape_cast %16 : vector<1x54x64xf32> to vector<54x64xf32>
    %cst_12 = arith.constant dense<0.000000e+00> : vector<16x64xf32>
    %18 = tpu.matmul %15, %17, %cst_12 {dimension_numbers = #tpu.dot_dimension_numbers<[1], [0], [0], [1], [0, 0, 1, 1], [], []>} : vector<16x54xf32>, vector<54x64xf32>, vector<16x64xf32> -> vector<16x64xf32>
    %19 = arith.addf %14, %18 : vector<16x64xf32>
    %cst_13 = arith.constant 0.000000e+00 : f32
    %20 = vector.broadcast %cst_13 : f32 to vector<16x64xf32>
    %21 = arith.maximumf %19, %20 : vector<16x64xf32>
    %c0_14 = arith.constant 0 : index
    %c0_15 = arith.constant 0 : index
    %c0_16 = arith.constant 0 : index
    %22 = vector.load %arg4[%c0_14, %c0_15, %c0_16] : memref<1x16x64xf32, #tpu.memory_space<vmem>>, vector<1x16x64xf32>
    %23 = vector.shape_cast %22 : vector<1x16x64xf32> to vector<16x64xf32>
    %24 = vector.shape_cast %21 : vector<16x64xf32> to vector<1x16x64xf32>
    tpu.vector_store %arg4[%c0_14, %c0_15, %c0_16], %24 {strides = array<i32>} : memref<1x16x64xf32, #tpu.memory_space<vmem>>, vector<1x16x64xf32>,
    return
  }
  func.func @transform_0(%arg0: i32) -> (i32, i32, i32) {
    %c0_i32 = arith.constant 0 : i32
    %c0_i32_0 = arith.constant 0 : i32
    %c0_i32_1 = arith.constant 0 : i32
    return %arg0, %c0_i32, %c0_i32_0 : i32, i32, i32
  }
  func.func @transform_1(%arg0: i32) -> (i32, i32, i32) {
    %c0_i32 = arith.constant 0 : i32
    %c0_i32_0 = arith.constant 0 : i32
    %c0_i32_1 = arith.constant 0 : i32
    %c0_i32_2 = arith.constant 0 : i32
    return %c0_i32, %c0_i32_0, %c0_i32_1 : i32, i32, i32
  }
  func.func @transform_2(%arg0: i32) -> (i32, i32) {
    %c0_i32 = arith.constant 0 : i32
    %c0_i32_0 = arith.constant 0 : i32
    %c0_i32_1 = arith.constant 0 : i32
    return %c0_i32, %c0_i32_0 : i32, i32
  }
  func.func @transform_3(%arg0: i32) -> (i32, i32, i32) {
    %c0_i32 = arith.constant 0 : i32
    %c0_i32_0 = arith.constant 0 : i32
    %c0_i32_1 = arith.constant 0 : i32
    return %arg0, %c0_i32, %c0_i32_0 : i32, i32, i32
  }
}

module attributes {stable_mosaic.version = 11 : i64} {
  func.func @conv3x3_bn_relu_kernel(%arg0: i32, %arg1: memref<1x18x72xf32, #tpu.memory_space<vmem>>, %arg2: memref<3x72x64xf32, #tpu.memory_space<vmem>>, %arg3: memref<1x64xf32, #tpu.memory_space<vmem>>, %arg4: memref<1x16x64xf32, #tpu.memory_space<vmem>>) attributes {dimension_semantics = [#tpu.dimension_semantics<parallel>], iteration_bounds = array<i64: 2>, scalar_prefetch = 0 : i64, scratch_operands = 0 : i64, tpu.core_type = #tpu.core_type<tc>, window_params = [{transform_indices = @transform_0, window_bounds = array<i64: 1, 18, 72>}, {pipeline_mode = #tpu.pipeline_mode<synchronous>, transform_indices = @transform_1, window_bounds = array<i64: 3, 72, 64>}, {pipeline_mode = #tpu.pipeline_mode<synchronous>, transform_indices = @transform_2, window_bounds = array<i64: 1, 64>}, {transform_indices = @transform_3, window_bounds = array<i64: 1, 16, 64>}]} {
    %c0 = arith.constant 0 : index
    %c0_0 = arith.constant 0 : index
    %c0_1 = arith.constant 0 : index
    %0 = vector.load %arg1[%c0, %c0_0, %c0_1] : memref<1x18x72xf32, #tpu.memory_space<vmem>>, vector<1x18x72xf32>
    %1 = vector.shape_cast %0 : vector<1x18x72xf32> to vector<18x72xf32>
    %c0_2 = arith.constant 0 : index
    %c0_3 = arith.constant 0 : index
    %2 = vector.load %arg3[%c0_2, %c0_3] : memref<1x64xf32, #tpu.memory_space<vmem>>, vector<1x64xf32>
    %3 = vector.shape_cast %2 : vector<1x64xf32> to vector<1x64xf32>
    %4 = vector.broadcast %3 : vector<1x64xf32> to vector<16x64xf32>
    %5 = vector.extract_strided_slice %1 {offsets = [0, 0], sizes = [16, 72], strides = [1, 1]} : vector<18x72xf32> to vector<16x72xf32>
    %c0_4 = arith.constant 0 : index
    %c0_5 = arith.constant 0 : index
    %c0_6 = arith.constant 0 : index
    %6 = vector.load %arg2[%c0_4, %c0_5, %c0_6] : memref<3x72x64xf32, #tpu.memory_space<vmem>>, vector<1x72x64xf32>
    %7 = vector.shape_cast %6 : vector<1x72x64xf32> to vector<72x64xf32>
    %cst = arith.constant dense<0.000000e+00> : vector<16x64xf32>
    %8 = tpu.matmul %5, %7, %cst {dimension_numbers = #tpu.dot_dimension_numbers<[1], [0], [0], [1], [0, 0, 1, 1], [], []>} : vector<16x72xf32>, vector<72x64xf32>, vector<16x64xf32> -> vector<16x64xf32>
    %9 = arith.addf %4, %8 : vector<16x64xf32>
    %10 = vector.extract_strided_slice %1 {offsets = [1, 0], sizes = [16, 72], strides = [1, 1]} : vector<18x72xf32> to vector<16x72xf32>
    %c1 = arith.constant 1 : index
    %c0_7 = arith.constant 0 : index
    %c0_8 = arith.constant 0 : index
    %11 = vector.load %arg2[%c1, %c0_7, %c0_8] : memref<3x72x64xf32, #tpu.memory_space<vmem>>, vector<1x72x64xf32>
    %12 = vector.shape_cast %11 : vector<1x72x64xf32> to vector<72x64xf32>
    %cst_9 = arith.constant dense<0.000000e+00> : vector<16x64xf32>
    %13 = tpu.matmul %10, %12, %cst_9 {dimension_numbers = #tpu.dot_dimension_numbers<[1], [0], [0], [1], [0, 0, 1, 1], [], []>} : vector<16x72xf32>, vector<72x64xf32>, vector<16x64xf32> -> vector<16x64xf32>
    %14 = arith.addf %9, %13 : vector<16x64xf32>
    %15 = vector.extract_strided_slice %1 {offsets = [2, 0], sizes = [16, 72], strides = [1, 1]} : vector<18x72xf32> to vector<16x72xf32>
    %c2 = arith.constant 2 : index
    %c0_10 = arith.constant 0 : index
    %c0_11 = arith.constant 0 : index
    %16 = vector.load %arg2[%c2, %c0_10, %c0_11] : memref<3x72x64xf32, #tpu.memory_space<vmem>>, vector<1x72x64xf32>
    %17 = vector.shape_cast %16 : vector<1x72x64xf32> to vector<72x64xf32>
    %cst_12 = arith.constant dense<0.000000e+00> : vector<16x64xf32>
    %18 = tpu.matmul %15, %17, %cst_12 {dimension_numbers = #tpu.dot_dimension_numbers<[1], [0], [0], [1], [0, 0, 1, 1], [], []>} : vector<16x72xf32>, vector<72x64xf32>, vector<16x64xf32> -> vector<16x64xf32>
    %19 = arith.addf %14, %18 : vector<16x64xf32>
    %cst_13 = arith.constant 0.000000e+00 : f32
    %20 = vector.broadcast %cst_13 : f32 to vector<16x64xf32>
    %21 = arith.maximumf %19, %20 : vector<16x64xf32>
    %c0_14 = arith.constant 0 : index
    %c0_15 = arith.constant 0 : index
    %c0_16 = arith.constant 0 : index
    %22 = vector.load %arg4[%c0_14, %c0_15, %c0_16] : memref<1x16x64xf32, #tpu.memory_space<vmem>>, vector<1x16x64xf32>
    %23 = vector.shape_cast %22 : vector<1x16x64xf32> to vector<16x64xf32>
    %24 = vector.shape_cast %21 : vector<16x64xf32> to vector<1x16x64xf32>
    tpu.vector_store %arg4[%c0_14, %c0_15, %c0_16], %24 {strides = array<i32>} : memref<1x16x64xf32, #tpu.memory_space<vmem>>, vector<1x16x64xf32>,
    return
  }
  func.func @transform_0(%arg0: i32) -> (i32, i32, i32) {
    %c0_i32 = arith.constant 0 : i32
    %c0_i32_0 = arith.constant 0 : i32
    %c0_i32_1 = arith.constant 0 : i32
    return %arg0, %c0_i32, %c0_i32_0 : i32, i32, i32
  }
  func.func @transform_1(%arg0: i32) -> (i32, i32, i32) {
    %c0_i32 = arith.constant 0 : i32
    %c0_i32_0 = arith.constant 0 : i32
    %c0_i32_1 = arith.constant 0 : i32
    %c0_i32_2 = arith.constant 0 : i32
    return %c0_i32, %c0_i32_0, %c0_i32_1 : i32, i32, i32
  }
  func.func @transform_2(%arg0: i32) -> (i32, i32) {
    %c0_i32 = arith.constant 0 : i32
    %c0_i32_0 = arith.constant 0 : i32
    %c0_i32_1 = arith.constant 0 : i32
    return %c0_i32, %c0_i32_0 : i32, i32
  }
  func.func @transform_3(%arg0: i32) -> (i32, i32, i32) {
    %c0_i32 = arith.constant 0 : i32
    %c0_i32_0 = arith.constant 0 : i32
    %c0_i32_1 = arith.constant 0 : i32
    return %arg0, %c0_i32, %c0_i32_0 : i32, i32, i32
  }
}

module attributes {stable_mosaic.version = 11 : i64} {
  func.func @conv3x3_bn_relu_kernel(%arg0: i32, %arg1: memref<1x10x40xf32, #tpu.memory_space<vmem>>, %arg2: memref<3x40x64xf32, #tpu.memory_space<vmem>>, %arg3: memref<1x64xf32, #tpu.memory_space<vmem>>, %arg4: memref<1x8x64xf32, #tpu.memory_space<vmem>>) attributes {dimension_semantics = [#tpu.dimension_semantics<parallel>], iteration_bounds = array<i64: 2>, scalar_prefetch = 0 : i64, scratch_operands = 0 : i64, tpu.core_type = #tpu.core_type<tc>, window_params = [{transform_indices = @transform_0, window_bounds = array<i64: 1, 10, 40>}, {pipeline_mode = #tpu.pipeline_mode<synchronous>, transform_indices = @transform_1, window_bounds = array<i64: 3, 40, 64>}, {pipeline_mode = #tpu.pipeline_mode<synchronous>, transform_indices = @transform_2, window_bounds = array<i64: 1, 64>}, {transform_indices = @transform_3, window_bounds = array<i64: 1, 8, 64>}]} {
    %c0 = arith.constant 0 : index
    %c0_0 = arith.constant 0 : index
    %c0_1 = arith.constant 0 : index
    %0 = vector.load %arg1[%c0, %c0_0, %c0_1] : memref<1x10x40xf32, #tpu.memory_space<vmem>>, vector<1x10x40xf32>
    %1 = vector.shape_cast %0 : vector<1x10x40xf32> to vector<10x40xf32>
    %c0_2 = arith.constant 0 : index
    %c0_3 = arith.constant 0 : index
    %2 = vector.load %arg3[%c0_2, %c0_3] : memref<1x64xf32, #tpu.memory_space<vmem>>, vector<1x64xf32>
    %3 = vector.shape_cast %2 : vector<1x64xf32> to vector<1x64xf32>
    %4 = vector.broadcast %3 : vector<1x64xf32> to vector<8x64xf32>
    %5 = vector.extract_strided_slice %1 {offsets = [0, 0], sizes = [8, 40], strides = [1, 1]} : vector<10x40xf32> to vector<8x40xf32>
    %c0_4 = arith.constant 0 : index
    %c0_5 = arith.constant 0 : index
    %c0_6 = arith.constant 0 : index
    %6 = vector.load %arg2[%c0_4, %c0_5, %c0_6] : memref<3x40x64xf32, #tpu.memory_space<vmem>>, vector<1x40x64xf32>
    %7 = vector.shape_cast %6 : vector<1x40x64xf32> to vector<40x64xf32>
    %cst = arith.constant dense<0.000000e+00> : vector<8x64xf32>
    %8 = tpu.matmul %5, %7, %cst {dimension_numbers = #tpu.dot_dimension_numbers<[1], [0], [0], [1], [0, 0, 1, 1], [], []>} : vector<8x40xf32>, vector<40x64xf32>, vector<8x64xf32> -> vector<8x64xf32>
    %9 = arith.addf %4, %8 : vector<8x64xf32>
    %10 = vector.extract_strided_slice %1 {offsets = [1, 0], sizes = [8, 40], strides = [1, 1]} : vector<10x40xf32> to vector<8x40xf32>
    %c1 = arith.constant 1 : index
    %c0_7 = arith.constant 0 : index
    %c0_8 = arith.constant 0 : index
    %11 = vector.load %arg2[%c1, %c0_7, %c0_8] : memref<3x40x64xf32, #tpu.memory_space<vmem>>, vector<1x40x64xf32>
    %12 = vector.shape_cast %11 : vector<1x40x64xf32> to vector<40x64xf32>
    %cst_9 = arith.constant dense<0.000000e+00> : vector<8x64xf32>
    %13 = tpu.matmul %10, %12, %cst_9 {dimension_numbers = #tpu.dot_dimension_numbers<[1], [0], [0], [1], [0, 0, 1, 1], [], []>} : vector<8x40xf32>, vector<40x64xf32>, vector<8x64xf32> -> vector<8x64xf32>
    %14 = arith.addf %9, %13 : vector<8x64xf32>
    %15 = vector.extract_strided_slice %1 {offsets = [2, 0], sizes = [8, 40], strides = [1, 1]} : vector<10x40xf32> to vector<8x40xf32>
    %c2 = arith.constant 2 : index
    %c0_10 = arith.constant 0 : index
    %c0_11 = arith.constant 0 : index
    %16 = vector.load %arg2[%c2, %c0_10, %c0_11] : memref<3x40x64xf32, #tpu.memory_space<vmem>>, vector<1x40x64xf32>
    %17 = vector.shape_cast %16 : vector<1x40x64xf32> to vector<40x64xf32>
    %cst_12 = arith.constant dense<0.000000e+00> : vector<8x64xf32>
    %18 = tpu.matmul %15, %17, %cst_12 {dimension_numbers = #tpu.dot_dimension_numbers<[1], [0], [0], [1], [0, 0, 1, 1], [], []>} : vector<8x40xf32>, vector<40x64xf32>, vector<8x64xf32> -> vector<8x64xf32>
    %19 = arith.addf %14, %18 : vector<8x64xf32>
    %cst_13 = arith.constant 0.000000e+00 : f32
    %20 = vector.broadcast %cst_13 : f32 to vector<8x64xf32>
    %21 = arith.maximumf %19, %20 : vector<8x64xf32>
    %c0_14 = arith.constant 0 : index
    %c0_15 = arith.constant 0 : index
    %c0_16 = arith.constant 0 : index
    %22 = vector.load %arg4[%c0_14, %c0_15, %c0_16] : memref<1x8x64xf32, #tpu.memory_space<vmem>>, vector<1x8x64xf32>
    %23 = vector.shape_cast %22 : vector<1x8x64xf32> to vector<8x64xf32>
    %24 = vector.shape_cast %21 : vector<8x64xf32> to vector<1x8x64xf32>
    tpu.vector_store %arg4[%c0_14, %c0_15, %c0_16], %24 {strides = array<i32>} : memref<1x8x64xf32, #tpu.memory_space<vmem>>, vector<1x8x64xf32>,
    return
  }
  func.func @transform_0(%arg0: i32) -> (i32, i32, i32) {
    %c0_i32 = arith.constant 0 : i32
    %c0_i32_0 = arith.constant 0 : i32
    %c0_i32_1 = arith.constant 0 : i32
    return %arg0, %c0_i32, %c0_i32_0 : i32, i32, i32
  }
  func.func @transform_1(%arg0: i32) -> (i32, i32, i32) {
    %c0_i32 = arith.constant 0 : i32
    %c0_i32_0 = arith.constant 0 : i32
    %c0_i32_1 = arith.constant 0 : i32
    %c0_i32_2 = arith.constant 0 : i32
    return %c0_i32, %c0_i32_0, %c0_i32_1 : i32, i32, i32
  }
  func.func @transform_2(%arg0: i32) -> (i32, i32) {
    %c0_i32 = arith.constant 0 : i32
    %c0_i32_0 = arith.constant 0 : i32
    %c0_i32_1 = arith.constant 0 : i32
    return %c0_i32, %c0_i32_0 : i32, i32
  }
  func.func @transform_3(%arg0: i32) -> (i32, i32, i32) {
    %c0_i32 = arith.constant 0 : i32
    %c0_i32_0 = arith.constant 0 : i32
    %c0_i32_1 = arith.constant 0 : i32
    return %arg0, %c0_i32, %c0_i32_0 : i32, i32, i32
  }
}

module attributes {stable_mosaic.version = 11 : i64} {
  func.func @conv3x3_bn_relu_kernel(%arg0: i32, %arg1: memref<1x10x80xf32, #tpu.memory_space<vmem>>, %arg2: memref<3x80x64xf32, #tpu.memory_space<vmem>>, %arg3: memref<1x64xf32, #tpu.memory_space<vmem>>, %arg4: memref<1x8x64xf32, #tpu.memory_space<vmem>>) attributes {dimension_semantics = [#tpu.dimension_semantics<parallel>], iteration_bounds = array<i64: 2>, scalar_prefetch = 0 : i64, scratch_operands = 0 : i64, tpu.core_type = #tpu.core_type<tc>, window_params = [{transform_indices = @transform_0, window_bounds = array<i64: 1, 10, 80>}, {pipeline_mode = #tpu.pipeline_mode<synchronous>, transform_indices = @transform_1, window_bounds = array<i64: 3, 80, 64>}, {pipeline_mode = #tpu.pipeline_mode<synchronous>, transform_indices = @transform_2, window_bounds = array<i64: 1, 64>}, {transform_indices = @transform_3, window_bounds = array<i64: 1, 8, 64>}]} {
    %c0 = arith.constant 0 : index
    %c0_0 = arith.constant 0 : index
    %c0_1 = arith.constant 0 : index
    %0 = vector.load %arg1[%c0, %c0_0, %c0_1] : memref<1x10x80xf32, #tpu.memory_space<vmem>>, vector<1x10x80xf32>
    %1 = vector.shape_cast %0 : vector<1x10x80xf32> to vector<10x80xf32>
    %c0_2 = arith.constant 0 : index
    %c0_3 = arith.constant 0 : index
    %2 = vector.load %arg3[%c0_2, %c0_3] : memref<1x64xf32, #tpu.memory_space<vmem>>, vector<1x64xf32>
    %3 = vector.shape_cast %2 : vector<1x64xf32> to vector<1x64xf32>
    %4 = vector.broadcast %3 : vector<1x64xf32> to vector<8x64xf32>
    %5 = vector.extract_strided_slice %1 {offsets = [0, 0], sizes = [8, 80], strides = [1, 1]} : vector<10x80xf32> to vector<8x80xf32>
    %c0_4 = arith.constant 0 : index
    %c0_5 = arith.constant 0 : index
    %c0_6 = arith.constant 0 : index
    %6 = vector.load %arg2[%c0_4, %c0_5, %c0_6] : memref<3x80x64xf32, #tpu.memory_space<vmem>>, vector<1x80x64xf32>
    %7 = vector.shape_cast %6 : vector<1x80x64xf32> to vector<80x64xf32>
    %cst = arith.constant dense<0.000000e+00> : vector<8x64xf32>
    %8 = tpu.matmul %5, %7, %cst {dimension_numbers = #tpu.dot_dimension_numbers<[1], [0], [0], [1], [0, 0, 1, 1], [], []>} : vector<8x80xf32>, vector<80x64xf32>, vector<8x64xf32> -> vector<8x64xf32>
    %9 = arith.addf %4, %8 : vector<8x64xf32>
    %10 = vector.extract_strided_slice %1 {offsets = [1, 0], sizes = [8, 80], strides = [1, 1]} : vector<10x80xf32> to vector<8x80xf32>
    %c1 = arith.constant 1 : index
    %c0_7 = arith.constant 0 : index
    %c0_8 = arith.constant 0 : index
    %11 = vector.load %arg2[%c1, %c0_7, %c0_8] : memref<3x80x64xf32, #tpu.memory_space<vmem>>, vector<1x80x64xf32>
    %12 = vector.shape_cast %11 : vector<1x80x64xf32> to vector<80x64xf32>
    %cst_9 = arith.constant dense<0.000000e+00> : vector<8x64xf32>
    %13 = tpu.matmul %10, %12, %cst_9 {dimension_numbers = #tpu.dot_dimension_numbers<[1], [0], [0], [1], [0, 0, 1, 1], [], []>} : vector<8x80xf32>, vector<80x64xf32>, vector<8x64xf32> -> vector<8x64xf32>
    %14 = arith.addf %9, %13 : vector<8x64xf32>
    %15 = vector.extract_strided_slice %1 {offsets = [2, 0], sizes = [8, 80], strides = [1, 1]} : vector<10x80xf32> to vector<8x80xf32>
    %c2 = arith.constant 2 : index
    %c0_10 = arith.constant 0 : index
    %c0_11 = arith.constant 0 : index
    %16 = vector.load %arg2[%c2, %c0_10, %c0_11] : memref<3x80x64xf32, #tpu.memory_space<vmem>>, vector<1x80x64xf32>
    %17 = vector.shape_cast %16 : vector<1x80x64xf32> to vector<80x64xf32>
    %cst_12 = arith.constant dense<0.000000e+00> : vector<8x64xf32>
    %18 = tpu.matmul %15, %17, %cst_12 {dimension_numbers = #tpu.dot_dimension_numbers<[1], [0], [0], [1], [0, 0, 1, 1], [], []>} : vector<8x80xf32>, vector<80x64xf32>, vector<8x64xf32> -> vector<8x64xf32>
    %19 = arith.addf %14, %18 : vector<8x64xf32>
    %cst_13 = arith.constant 0.000000e+00 : f32
    %20 = vector.broadcast %cst_13 : f32 to vector<8x64xf32>
    %21 = arith.maximumf %19, %20 : vector<8x64xf32>
    %c0_14 = arith.constant 0 : index
    %c0_15 = arith.constant 0 : index
    %c0_16 = arith.constant 0 : index
    %22 = vector.load %arg4[%c0_14, %c0_15, %c0_16] : memref<1x8x64xf32, #tpu.memory_space<vmem>>, vector<1x8x64xf32>
    %23 = vector.shape_cast %22 : vector<1x8x64xf32> to vector<8x64xf32>
    %24 = vector.shape_cast %21 : vector<8x64xf32> to vector<1x8x64xf32>
    tpu.vector_store %arg4[%c0_14, %c0_15, %c0_16], %24 {strides = array<i32>} : memref<1x8x64xf32, #tpu.memory_space<vmem>>, vector<1x8x64xf32>,
    return
  }
  func.func @transform_0(%arg0: i32) -> (i32, i32, i32) {
    %c0_i32 = arith.constant 0 : i32
    %c0_i32_0 = arith.constant 0 : i32
    %c0_i32_1 = arith.constant 0 : i32
    return %arg0, %c0_i32, %c0_i32_0 : i32, i32, i32
  }
  func.func @transform_1(%arg0: i32) -> (i32, i32, i32) {
    %c0_i32 = arith.constant 0 : i32
    %c0_i32_0 = arith.constant 0 : i32
    %c0_i32_1 = arith.constant 0 : i32
    %c0_i32_2 = arith.constant 0 : i32
    return %c0_i32, %c0_i32_0, %c0_i32_1 : i32, i32, i32
  }
  func.func @transform_2(%arg0: i32) -> (i32, i32) {
    %c0_i32 = arith.constant 0 : i32
    %c0_i32_0 = arith.constant 0 : i32
    %c0_i32_1 = arith.constant 0 : i32
    return %c0_i32, %c0_i32_0 : i32, i32
  }
  func.func @transform_3(%arg0: i32) -> (i32, i32, i32) {
    %c0_i32 = arith.constant 0 : i32
    %c0_i32_0 = arith.constant 0 : i32
    %c0_i32_1 = arith.constant 0 : i32
    return %arg0, %c0_i32, %c0_i32_0 : i32, i32, i32
  }
}

module attributes {stable_mosaic.version = 11 : i64} {
  func.func @conv3x3_bn_relu_kernel(%arg0: i32, %arg1: memref<1x10x80xf32, #tpu.memory_space<vmem>>, %arg2: memref<3x80x32xf32, #tpu.memory_space<vmem>>, %arg3: memref<1x32xf32, #tpu.memory_space<vmem>>, %arg4: memref<1x8x32xf32, #tpu.memory_space<vmem>>) attributes {dimension_semantics = [#tpu.dimension_semantics<parallel>], iteration_bounds = array<i64: 2>, scalar_prefetch = 0 : i64, scratch_operands = 0 : i64, tpu.core_type = #tpu.core_type<tc>, window_params = [{transform_indices = @transform_0, window_bounds = array<i64: 1, 10, 80>}, {pipeline_mode = #tpu.pipeline_mode<synchronous>, transform_indices = @transform_1, window_bounds = array<i64: 3, 80, 32>}, {pipeline_mode = #tpu.pipeline_mode<synchronous>, transform_indices = @transform_2, window_bounds = array<i64: 1, 32>}, {transform_indices = @transform_3, window_bounds = array<i64: 1, 8, 32>}]} {
    %c0 = arith.constant 0 : index
    %c0_0 = arith.constant 0 : index
    %c0_1 = arith.constant 0 : index
    %0 = vector.load %arg1[%c0, %c0_0, %c0_1] : memref<1x10x80xf32, #tpu.memory_space<vmem>>, vector<1x10x80xf32>
    %1 = vector.shape_cast %0 : vector<1x10x80xf32> to vector<10x80xf32>
    %c0_2 = arith.constant 0 : index
    %c0_3 = arith.constant 0 : index
    %2 = vector.load %arg3[%c0_2, %c0_3] : memref<1x32xf32, #tpu.memory_space<vmem>>, vector<1x32xf32>
    %3 = vector.shape_cast %2 : vector<1x32xf32> to vector<1x32xf32>
    %4 = vector.broadcast %3 : vector<1x32xf32> to vector<8x32xf32>
    %5 = vector.extract_strided_slice %1 {offsets = [0, 0], sizes = [8, 80], strides = [1, 1]} : vector<10x80xf32> to vector<8x80xf32>
    %c0_4 = arith.constant 0 : index
    %c0_5 = arith.constant 0 : index
    %c0_6 = arith.constant 0 : index
    %6 = vector.load %arg2[%c0_4, %c0_5, %c0_6] : memref<3x80x32xf32, #tpu.memory_space<vmem>>, vector<1x80x32xf32>
    %7 = vector.shape_cast %6 : vector<1x80x32xf32> to vector<80x32xf32>
    %cst = arith.constant dense<0.000000e+00> : vector<8x32xf32>
    %8 = tpu.matmul %5, %7, %cst {dimension_numbers = #tpu.dot_dimension_numbers<[1], [0], [0], [1], [0, 0, 1, 1], [], []>} : vector<8x80xf32>, vector<80x32xf32>, vector<8x32xf32> -> vector<8x32xf32>
    %9 = arith.addf %4, %8 : vector<8x32xf32>
    %10 = vector.extract_strided_slice %1 {offsets = [1, 0], sizes = [8, 80], strides = [1, 1]} : vector<10x80xf32> to vector<8x80xf32>
    %c1 = arith.constant 1 : index
    %c0_7 = arith.constant 0 : index
    %c0_8 = arith.constant 0 : index
    %11 = vector.load %arg2[%c1, %c0_7, %c0_8] : memref<3x80x32xf32, #tpu.memory_space<vmem>>, vector<1x80x32xf32>
    %12 = vector.shape_cast %11 : vector<1x80x32xf32> to vector<80x32xf32>
    %cst_9 = arith.constant dense<0.000000e+00> : vector<8x32xf32>
    %13 = tpu.matmul %10, %12, %cst_9 {dimension_numbers = #tpu.dot_dimension_numbers<[1], [0], [0], [1], [0, 0, 1, 1], [], []>} : vector<8x80xf32>, vector<80x32xf32>, vector<8x32xf32> -> vector<8x32xf32>
    %14 = arith.addf %9, %13 : vector<8x32xf32>
    %15 = vector.extract_strided_slice %1 {offsets = [2, 0], sizes = [8, 80], strides = [1, 1]} : vector<10x80xf32> to vector<8x80xf32>
    %c2 = arith.constant 2 : index
    %c0_10 = arith.constant 0 : index
    %c0_11 = arith.constant 0 : index
    %16 = vector.load %arg2[%c2, %c0_10, %c0_11] : memref<3x80x32xf32, #tpu.memory_space<vmem>>, vector<1x80x32xf32>
    %17 = vector.shape_cast %16 : vector<1x80x32xf32> to vector<80x32xf32>
    %cst_12 = arith.constant dense<0.000000e+00> : vector<8x32xf32>
    %18 = tpu.matmul %15, %17, %cst_12 {dimension_numbers = #tpu.dot_dimension_numbers<[1], [0], [0], [1], [0, 0, 1, 1], [], []>} : vector<8x80xf32>, vector<80x32xf32>, vector<8x32xf32> -> vector<8x32xf32>
    %19 = arith.addf %14, %18 : vector<8x32xf32>
    %cst_13 = arith.constant 0.000000e+00 : f32
    %20 = vector.broadcast %cst_13 : f32 to vector<8x32xf32>
    %21 = arith.maximumf %19, %20 : vector<8x32xf32>
    %c0_14 = arith.constant 0 : index
    %c0_15 = arith.constant 0 : index
    %c0_16 = arith.constant 0 : index
    %22 = vector.load %arg4[%c0_14, %c0_15, %c0_16] : memref<1x8x32xf32, #tpu.memory_space<vmem>>, vector<1x8x32xf32>
    %23 = vector.shape_cast %22 : vector<1x8x32xf32> to vector<8x32xf32>
    %24 = vector.shape_cast %21 : vector<8x32xf32> to vector<1x8x32xf32>
    tpu.vector_store %arg4[%c0_14, %c0_15, %c0_16], %24 {strides = array<i32>} : memref<1x8x32xf32, #tpu.memory_space<vmem>>, vector<1x8x32xf32>,
    return
  }
  func.func @transform_0(%arg0: i32) -> (i32, i32, i32) {
    %c0_i32 = arith.constant 0 : i32
    %c0_i32_0 = arith.constant 0 : i32
    %c0_i32_1 = arith.constant 0 : i32
    return %arg0, %c0_i32, %c0_i32_0 : i32, i32, i32
  }
  func.func @transform_1(%arg0: i32) -> (i32, i32, i32) {
    %c0_i32 = arith.constant 0 : i32
    %c0_i32_0 = arith.constant 0 : i32
    %c0_i32_1 = arith.constant 0 : i32
    %c0_i32_2 = arith.constant 0 : i32
    return %c0_i32, %c0_i32_0, %c0_i32_1 : i32, i32, i32
  }
  func.func @transform_2(%arg0: i32) -> (i32, i32) {
    %c0_i32 = arith.constant 0 : i32
    %c0_i32_0 = arith.constant 0 : i32
    %c0_i32_1 = arith.constant 0 : i32
    return %c0_i32, %c0_i32_0 : i32, i32
  }
  func.func @transform_3(%arg0: i32) -> (i32, i32, i32) {
    %c0_i32 = arith.constant 0 : i32
    %c0_i32_0 = arith.constant 0 : i32
    %c0_i32_1 = arith.constant 0 : i32
    return %arg0, %c0_i32, %c0_i32_0 : i32, i32, i32
  }
}

module attributes {stable_mosaic.version = 11 : i64} {
  func.func @conv3x3_bn_relu_kernel(%arg0: i32, %arg1: memref<1x10x40xf32, #tpu.memory_space<vmem>>, %arg2: memref<3x40x32xf32, #tpu.memory_space<vmem>>, %arg3: memref<1x32xf32, #tpu.memory_space<vmem>>, %arg4: memref<1x8x32xf32, #tpu.memory_space<vmem>>) attributes {dimension_semantics = [#tpu.dimension_semantics<parallel>], iteration_bounds = array<i64: 2>, scalar_prefetch = 0 : i64, scratch_operands = 0 : i64, tpu.core_type = #tpu.core_type<tc>, window_params = [{transform_indices = @transform_0, window_bounds = array<i64: 1, 10, 40>}, {pipeline_mode = #tpu.pipeline_mode<synchronous>, transform_indices = @transform_1, window_bounds = array<i64: 3, 40, 32>}, {pipeline_mode = #tpu.pipeline_mode<synchronous>, transform_indices = @transform_2, window_bounds = array<i64: 1, 32>}, {transform_indices = @transform_3, window_bounds = array<i64: 1, 8, 32>}]} {
    %c0 = arith.constant 0 : index
    %c0_0 = arith.constant 0 : index
    %c0_1 = arith.constant 0 : index
    %0 = vector.load %arg1[%c0, %c0_0, %c0_1] : memref<1x10x40xf32, #tpu.memory_space<vmem>>, vector<1x10x40xf32>
    %1 = vector.shape_cast %0 : vector<1x10x40xf32> to vector<10x40xf32>
    %c0_2 = arith.constant 0 : index
    %c0_3 = arith.constant 0 : index
    %2 = vector.load %arg3[%c0_2, %c0_3] : memref<1x32xf32, #tpu.memory_space<vmem>>, vector<1x32xf32>
    %3 = vector.shape_cast %2 : vector<1x32xf32> to vector<1x32xf32>
    %4 = vector.broadcast %3 : vector<1x32xf32> to vector<8x32xf32>
    %5 = vector.extract_strided_slice %1 {offsets = [0, 0], sizes = [8, 40], strides = [1, 1]} : vector<10x40xf32> to vector<8x40xf32>
    %c0_4 = arith.constant 0 : index
    %c0_5 = arith.constant 0 : index
    %c0_6 = arith.constant 0 : index
    %6 = vector.load %arg2[%c0_4, %c0_5, %c0_6] : memref<3x40x32xf32, #tpu.memory_space<vmem>>, vector<1x40x32xf32>
    %7 = vector.shape_cast %6 : vector<1x40x32xf32> to vector<40x32xf32>
    %cst = arith.constant dense<0.000000e+00> : vector<8x32xf32>
    %8 = tpu.matmul %5, %7, %cst {dimension_numbers = #tpu.dot_dimension_numbers<[1], [0], [0], [1], [0, 0, 1, 1], [], []>} : vector<8x40xf32>, vector<40x32xf32>, vector<8x32xf32> -> vector<8x32xf32>
    %9 = arith.addf %4, %8 : vector<8x32xf32>
    %10 = vector.extract_strided_slice %1 {offsets = [1, 0], sizes = [8, 40], strides = [1, 1]} : vector<10x40xf32> to vector<8x40xf32>
    %c1 = arith.constant 1 : index
    %c0_7 = arith.constant 0 : index
    %c0_8 = arith.constant 0 : index
    %11 = vector.load %arg2[%c1, %c0_7, %c0_8] : memref<3x40x32xf32, #tpu.memory_space<vmem>>, vector<1x40x32xf32>
    %12 = vector.shape_cast %11 : vector<1x40x32xf32> to vector<40x32xf32>
    %cst_9 = arith.constant dense<0.000000e+00> : vector<8x32xf32>
    %13 = tpu.matmul %10, %12, %cst_9 {dimension_numbers = #tpu.dot_dimension_numbers<[1], [0], [0], [1], [0, 0, 1, 1], [], []>} : vector<8x40xf32>, vector<40x32xf32>, vector<8x32xf32> -> vector<8x32xf32>
    %14 = arith.addf %9, %13 : vector<8x32xf32>
    %15 = vector.extract_strided_slice %1 {offsets = [2, 0], sizes = [8, 40], strides = [1, 1]} : vector<10x40xf32> to vector<8x40xf32>
    %c2 = arith.constant 2 : index
    %c0_10 = arith.constant 0 : index
    %c0_11 = arith.constant 0 : index
    %16 = vector.load %arg2[%c2, %c0_10, %c0_11] : memref<3x40x32xf32, #tpu.memory_space<vmem>>, vector<1x40x32xf32>
    %17 = vector.shape_cast %16 : vector<1x40x32xf32> to vector<40x32xf32>
    %cst_12 = arith.constant dense<0.000000e+00> : vector<8x32xf32>
    %18 = tpu.matmul %15, %17, %cst_12 {dimension_numbers = #tpu.dot_dimension_numbers<[1], [0], [0], [1], [0, 0, 1, 1], [], []>} : vector<8x40xf32>, vector<40x32xf32>, vector<8x32xf32> -> vector<8x32xf32>
    %19 = arith.addf %14, %18 : vector<8x32xf32>
    %cst_13 = arith.constant 0.000000e+00 : f32
    %20 = vector.broadcast %cst_13 : f32 to vector<8x32xf32>
    %21 = arith.maximumf %19, %20 : vector<8x32xf32>
    %c0_14 = arith.constant 0 : index
    %c0_15 = arith.constant 0 : index
    %c0_16 = arith.constant 0 : index
    %22 = vector.load %arg4[%c0_14, %c0_15, %c0_16] : memref<1x8x32xf32, #tpu.memory_space<vmem>>, vector<1x8x32xf32>
    %23 = vector.shape_cast %22 : vector<1x8x32xf32> to vector<8x32xf32>
    %24 = vector.shape_cast %21 : vector<8x32xf32> to vector<1x8x32xf32>
    tpu.vector_store %arg4[%c0_14, %c0_15, %c0_16], %24 {strides = array<i32>} : memref<1x8x32xf32, #tpu.memory_space<vmem>>, vector<1x8x32xf32>,
    return
  }
  func.func @transform_0(%arg0: i32) -> (i32, i32, i32) {
    %c0_i32 = arith.constant 0 : i32
    %c0_i32_0 = arith.constant 0 : i32
    %c0_i32_1 = arith.constant 0 : i32
    return %arg0, %c0_i32, %c0_i32_0 : i32, i32, i32
  }
  func.func @transform_1(%arg0: i32) -> (i32, i32, i32) {
    %c0_i32 = arith.constant 0 : i32
    %c0_i32_0 = arith.constant 0 : i32
    %c0_i32_1 = arith.constant 0 : i32
    %c0_i32_2 = arith.constant 0 : i32
    return %c0_i32, %c0_i32_0, %c0_i32_1 : i32, i32, i32
  }
  func.func @transform_2(%arg0: i32) -> (i32, i32) {
    %c0_i32 = arith.constant 0 : i32
    %c0_i32_0 = arith.constant 0 : i32
    %c0_i32_1 = arith.constant 0 : i32
    return %c0_i32, %c0_i32_0 : i32, i32
  }
  func.func @transform_3(%arg0: i32) -> (i32, i32, i32) {
    %c0_i32 = arith.constant 0 : i32
    %c0_i32_0 = arith.constant 0 : i32
    %c0_i32_1 = arith.constant 0 : i32
    return %arg0, %c0_i32, %c0_i32_0 : i32, i32, i32
  }
}

</mosaic_0001>

<bundles_post_ra>
// kernel: tile.43
= control target key start
LH: loop header
LB: loop body
LE: loop exit
PB: predicated region body
PF: predicated region fallthrough
CT: control target
= control target key end

     0   :  { %s28_s0 = inlined_call_operand.vmem [shape: f32[4], index: 0, kind: input, shape index: {}]   ;;  %s29_s1 = inlined_call_operand.vmem [shape: f32[16,4], index: 1, kind: output, shape index: {}]  }
   0x1   :  { %v4_v0 = vld [vmem:[%s28_s0] ss:$0 sm:$0xff] }
   0x2   :  { %5 = vst [vmem:[%s29_s1] sm:$0xff] %v4_v0  ;;  %8 = vst [vmem:[%s29_s1 + $0x8] sm:$0xff] %v4_v0 }

// kernel: tile.44
= control target key start
LH: loop header
LB: loop body
LE: loop exit
PB: predicated region body
PF: predicated region fallthrough
CT: control target
= control target key end

     0   :  { %s131_s10 = smov 60   ;;  %s132_s11 = smov 52   ;;  %vm3_vm0 = vcmask 31744   ;;  %vm9_vm1 = vcmask 523744   ;;  %vm15_vm2 = vcmask 490944   ;;  %vm21_vm3 = vcmask 458144   ;;  %s207_s0 = inlined_call_operand.vmem [shape: f32[16,4], index: 0, kind: input, shape index: {}]   ;;  %s208_s1 = inlined_call_operand.vmem [shape: f32[1,64], index: 1, kind: output, shape index: {}]  }
   0x1   :  { %v101_v0 = vld [vmem:[%s207_s0 + $0xf] sm:$0x1]   ;;  %v103_v1 = vld [vmem:[%s207_s0 + $0xd] sm:$0x1]   ;;  %v102_v2 = vld [vmem:[%s207_s0 + $0xe] sm:$0x1]  }
   0x2   :  { %7 = vrot.lane.b32.xlu0 %v101_v0, %s131_s10  ;;  %19 = vrot.lane.b32.xlu1 %v103_v1, %s132_s11  ;;  %v104_v3 = vld [vmem:[%s207_s0 + $0xc] sm:$0x1]   ;;  %s133_s16 = smov 56   ;;  %s134_s17 = smov 48   ;;  %v105_v4 = vld [vmem:[%s207_s0 + $0xb] sm:$0x1]  }
   0x3   :  { %v106_v5 = vld [vmem:[%s207_s0 + $0xa] sm:$0x1]   ;;  %v2_v6 = vld [vmem:[%s207_s0] sm:$0x1]   ;;  %s135_s24 = smov 44   ;;  %s136_s25 = smov 40  }
   0x4   :  { %4 = vst.msk [vmem:[#allocation0] sm:$0x1] %vm3_vm0, %v2_v6   ;;  %v107_v7 = vld [vmem:[%s207_s0 + $0x9] sm:$0x1]   ;;  %v108_v8 = vld [vmem:[%s207_s0 + $0x8] sm:$0x1]  }
   0x5   :  { %s137_s30 = smov 36   ;;  %s138_s2 = smov 32   ;;  %v109_v9 = vld [vmem:[%s207_s0 + $0x7] sm:$0x1]   ;;  %v110_v10 = vld [vmem:[%s207_s0 + $0x6] sm:$0x1]  }
   0x6   :  { %13 = vrot.lane.b32.xlu0 %v102_v2, %s133_s16  ;;  %25 = vrot.lane.b32.xlu1 %v104_v3, %s134_s17  ;;  %s139_s7 = smov 28   ;;  %s140_s8 = smov 24   ;;  %v111_v11 = vld [vmem:[%s207_s0 + $0x5] sm:$0x1]   ;;  %v112_v12 = vld [vmem:[%s207_s0 + $0x4] sm:$0x1]  }
   0x7   :  { %s141_s13 = smov 20   ;;  %s142_s14 = smov 16   ;;  %v113_v13 = vld [vmem:[%s207_s0 + $0x3] sm:$0x1]   ;;  %v114_v14 = vld [vmem:[%s207_s0 + $0x2] sm:$0x1]  }
   0x8   :  { %s143_s19 = smov 12   ;;  %s144_s20 = smov 8   ;;  %v115_v15 = vld [vmem:[%s207_s0 + $0x1] sm:$0x1]   ;;  %vm27_vm4 = vcmask 425344   ;;  %vm33_vm5 = vcmask 392544  }
   0x9   :  { %s145_s0 = smov 4   ;;  %vm39_vm6 = vcmask 359744   ;;  %vm45_vm7 = vcmask 326944   ;;  %vm51_vm8 = vcmask 294144   ;;  %vm57_vm9 = vcmask 261344  }
   0xa   :  { %31 = vrot.lane.b32.xlu0 %v105_v4, %s135_s24  ;;  %37 = vrot.lane.b32.xlu1 %v106_v5, %s136_s25  ;;  %vm63_vm10 = vcmask 228544   ;;  %vm69_vm11 = vcmask 195744   ;;  %vm75_vm12 = vcmask 162944   ;;  %vm81_vm13 = vcmask 130144  }
   0xb   :  { %vm87_vm14 = vcmask 97344   ;;  %vm93_vm15 = vcmask 64544  }
   0xe   :  { %43 = vrot.lane.b32.xlu0 %v107_v7, %s137_s30  ;;  %49 = vrot.lane.b32.xlu1 %v108_v8, %s138_s2 }
  0x12   :  { %55 = vrot.lane.b32.xlu0 %v109_v9, %s139_s7  ;;  %61 = vrot.lane.b32.xlu1 %v110_v10, %s140_s8 }
  0x16   :  { %67 = vrot.lane.b32.xlu0 %v111_v11, %s141_s13  ;;  %73 = vrot.lane.b32.xlu1 %v112_v12, %s142_s14 }
  0x1a   :  { %79 = vrot.lane.b32.xlu0 %v113_v13, %s143_s19  ;;  %85 = vrot.lane.b32.xlu1 %v114_v14, %s144_s20 }
  0x1e   :  { %91 = vrot.lane.b32.xlu0 %v115_v15, %s145_s0 }
  0x74   :  { %v8_v16 = vpop.permute.xlu0 %7   ;;  %v20_v17 = vpop.permute.xlu1 %19  }
  0x75   :  { %10 = vst.msk [vmem:[#allocation0] sm:$0x1] %vm9_vm1, %v8_v16  }
  0x78   :  { %v14_v18 = vpop.permute.xlu0 %13   ;;  %v26_v19 = vpop.permute.xlu1 %25  }
  0x79   :  { %16 = vst.msk [vmem:[#allocation0] sm:$0x1] %vm15_vm2, %v14_v18  }
  0x7a   :  { %22 = vst.msk [vmem:[#allocation0] sm:$0x1] %vm21_vm3, %v20_v17  }
  0x7b   :  { %28 = vst.msk [vmem:[#allocation0] sm:$0x1] %vm27_vm4, %v26_v19  }
  0x7c   :  { %v32_v20 = vpop.permute.xlu0 %31   ;;  %v38_v21 = vpop.permute.xlu1 %37  }
  0x7d   :  { %34 = vst.msk [vmem:[#allocation0] sm:$0x1] %vm33_vm5, %v32_v20  }
  0x7e   :  { %40 = vst.msk [vmem:[#allocation0] sm:$0x1] %vm39_vm6, %v38_v21  }
  0x80   :  { %v44_v22 = vpop.permute.xlu0 %43   ;;  %v50_v23 = vpop.permute.xlu1 %49  }
  0x81   :  { %46 = vst.msk [vmem:[#allocation0] sm:$0x1] %vm45_vm7, %v44_v22  }
  0x82   :  { %52 = vst.msk [vmem:[#allocation0] sm:$0x1] %vm51_vm8, %v50_v23  }
  0x84   :  { %v56_v24 = vpop.permute.xlu0 %55   ;;  %v62_v25 = vpop.permute.xlu1 %61  }
  0x85   :  { %58 = vst.msk [vmem:[#allocation0] sm:$0x1] %vm57_vm9, %v56_v24  }
  0x86   :  { %64 = vst.msk [vmem:[#allocation0] sm:$0x1] %vm63_vm10, %v62_v25  }
  0x88   :  { %v68_v26 = vpop.permute.xlu0 %67   ;;  %v74_v27 = vpop.permute.xlu1 %73  }
  0x89   :  { %70 = vst.msk [vmem:[#allocation0] sm:$0x1] %vm69_vm11, %v68_v26  }
  0x8a   :  { %76 = vst.msk [vmem:[#allocation0] sm:$0x1] %vm75_vm12, %v74_v27  }
  0x8c   :  { %v80_v28 = vpop.permute.xlu0 %79   ;;  %v86_v29 = vpop.permute.xlu1 %85  }
  0x8d   :  { %82 = vst.msk [vmem:[#allocation0] sm:$0x1] %vm81_vm13, %v80_v28  }
  0x8e   :  { %88 = vst.msk [vmem:[#allocation0] sm:$0x1] %vm87_vm14, %v86_v29  }
  0x90   :  { %v92_v30 = vpop.permute.xlu0 %91  }
  0x91   :  { %94 = vst.msk [vmem:[#allocation0] sm:$0x1] %vm93_vm15, %v92_v30  }
  0x98   :  { %v98_v31 = vld [vmem:[#allocation0] sm:$0x1] }
  0x99   :  { %100 = vst [vmem:[%s208_s1] sm:$0x1] %v98_v31 }

// kernel: sharednet_forward.8
= control target key start
LH: loop header
LB: loop body
LE: loop exit
PB: predicated region body
PF: predicated region fallthrough
CT: control target
= control target key end

     0   :  { %s724_s12 = smov 0   ;;  %s827_s0 = inlined_call_operand.vmem [shape: f32[2,18,54], index: 0, kind: input, shape index: {}]   ;;  %s828_s1 = inlined_call_operand.vmem [shape: f32[3,54,64], index: 1, kind: input, shape index: {}]   ;;  %s829_s2 = inlined_call_operand.vmem [shape: f32[1,64], index: 2, kind: input, shape index: {}]   ;;  %s830_s3 = inlined_call_operand.vmem [shape: f32[2,16,64], index: 3, kind: output, shape index: {}]  }
   0x1 LB: > { %s532_s13 = sadd.s32 4294967295, %s702_s12   ;;  %p536_p0 = scmp.ge.s32.totalorder %s702_s12, 1  ;;  %s702_s12 = sphi %s724_s12, %s13_s12  }
   0x2   : > { %p137_p1 = scmp.lt.s32.totalorder %s702_s12, 3 }
   0x4   : > { %p138_p2 = pnand %p536_p0, %p137_p1 }
   0x5   : > { %v544_v0 = vld [vmem:[%s828_s1 + $0x38] sm:$0xff] (!%p138_p2)  ;;  %v545_v1 = vld [vmem:[%s828_s1 + $0x40] sm:$0xff] (!%p138_p2)  ;;  %v546_v2 = vld [vmem:[%s828_s1 + $0x48] sm:$0xff] (!%p138_p2)  ;;  %p161_p3 = scmp.lt.s32.totalorder (!%p138_p2), %s532_s13, 1  ;;  %vm188_vm0 = vcmask (!%p138_p2), 441344   ;;  %vm285_vm1 = vcmask (!%p138_p2), 1046528  }
   0x6   : > { %141 = sbr.rel (%p138_p2) target bundleno = 254 (0xfe), region = 32  ;;  %v657_v3 = vpack.c.bf16 (!%p138_p2), %v545_v1, %v544_v0  ;;  %v547_v4 = vld [vmem:[%s828_s1 + $0x50] sm:$0xff] (!%p138_p2)  ;;  %v548_v5 = vld [vmem:[%s828_s1 + $0x58] sm:$0xff] (!%p138_p2)  ;;  %v549_v7 = vld [vmem:[%s828_s1 + $0x60] sm:$0xff] (!%p138_p2)  ;;  %vm195_vm2 = vcmask (!%p138_p2), 1045504   ;;  %vm474_vm3 = vcmask (!%p138_p2), 523264  }
   0x7   : > { %v661_v6 = vpack.c.bf16 (!%p138_p2), %v547_v4, %v546_v2  ;;  %v181_v8 = vld [vmem:[%s828_s1] sm:$0xff] (!%p138_p2)  ;;  %v182_v9 = vld [vmem:[%s828_s1 + $0x8] sm:$0xff] (!%p138_p2)  ;;  %v183_v11 = vld [vmem:[%s828_s1 + $0x10] sm:$0xff] (!%p138_p2)  ;;  %v665_v13 = vpack.c.bf16 (!%p138_p2), %v549_v7, %v548_v5 }
   0x8   : > { %658 = vmatprep.subr.bf16.mxu0 (!%p138_p2), %v657_v3  ;;  %v645_v10 = vpack.c.bf16 (!%p138_p2), %v182_v9, %v181_v8  ;;  %v184_v12 = vld [vmem:[%s828_s1 + $0x18] sm:$0xff] (!%p138_p2)  ;;  %v185_v15 = vld [vmem:[%s828_s1 + $0x20] sm:$0xff] (!%p138_p2)  ;;  %v186_v16 = vld [vmem:[%s828_s1 + $0x28] sm:$0xff] (!%p138_p2) }
   0x9   : > { %660 = vmatpush3.bf16.msra.mxu0 (!%p138_p2), %v657_v3  ;;  %v649_v14 = vpack.c.bf16 (!%p138_p2), %v184_v12, %v183_v11  ;;  %v653_v20 = vpack.c.bf16 (!%p138_p2), %v186_v16, %v185_v15  ;;  %v550_v23 = vld [vmem:[%s828_s1 + $0x68] sm:$0x3f] (!%p138_p2)  ;;  %v554_v25 = vld [vmem:[%s828_s1 + $0x70] sm:$0xff] (!%p138_p2)  ;;  %v555_v26 = vld [vmem:[%s828_s1 + $0x78] sm:$0xff] (!%p138_p2) }
   0xa   : > { %662 = vmatprep.subr.bf16.mxu0 (!%p138_p2), %v661_v6  ;;  %646 = vmatprep.subr.bf16.mxu1 (!%p138_p2), %v645_v10  ;;  %v556_v28 = vld [vmem:[%s828_s1 + $0x80] sm:$0xff] (!%p138_p2)  ;;  %v557_v29 = vld [vmem:[%s828_s1 + $0x88] sm:$0xff] (!%p138_p2)  ;;  %v187_v30 = vld [vmem:[%s828_s1 + $0x30] sm:$0x3f] (!%p138_p2)  ;;  %v669_v31 = vpack.c.bf16 (!%p138_p2), %v555_v26, %v554_v25 }
   0xb   : > { %648 = vmatpush3.bf16.msra.mxu1 (!%p138_p2), %v645_v10  ;;  %v673_v35 = vpack.c.bf16 (!%p138_p2), %v557_v29, %v556_v28  ;;  %v558_v36 = vld [vmem:[%s828_s1 + $0x90] sm:$0xff] (!%p138_p2)  ;;  %v559_v37 = vld [vmem:[%s828_s1 + $0x98] sm:$0xff] (!%p138_p2)  ;;  %v560_v41 = vld [vmem:[%s828_s1 + $0xa0] sm:$0x3f] (!%p138_p2) }
   0xc   : > { %650 = vmatprep.subr.bf16.mxu1 (!%p138_p2), %v649_v14  ;;  %v677_v39 = vpack.c.bf16 (!%p138_p2), %v559_v37, %v558_v36  ;;  %v540_v45 = vld [vmem:[%s829_s2] ss:$0 sm:$0xff] (!%p138_p2) }
   0xd   : > { %s832_s13 = smov (!%p161_p3, %s532_s13), 1  ;;  %664 = vmatpush3.bf16.msra.mxu0 %v661_v6 }
   0xe   : > { %s687_s5 = smul.u32 24, %s832_s13  ;;  %666 = vmatprep.subr.bf16.mxu0 %v665_v13  ;;  %s566_s10 = sshll.u32 %s832_s13, 4 }
   0xf   : > { %652 = vmatpush3.bf16.msra.mxu1 %v649_v14  ;;  %s170_s15 = scalar_lea.vmem %s830_s3, %s566_s10 }
  0x10   : > { %s165_s16 = scalar_lea.vmem %s827_s0, %s687_s5  ;;  %654 = vmatprep.subr.bf16.mxu1 %v653_v20 }
  0x11   : > { %v171_v17 = vld [vmem:[%s165_s16] sm:$0xff]  ;;  %v172_v18 = vld [vmem:[%s165_s16 + $0x8] sm:$0xff]  ;;  %v173_v19 = vld [vmem:[%s165_s16 + $0x10] sm:$0x3]  ;;  %668 = vmatpush3.bf16.msra.mxu0 %v665_v13 }
  0x12   : > { %v286_v21 = vrot.slane %v171_v17, 1  ;;  %v287_v22 = vrot.slane %v172_v18, 1  ;;  %608 = vmatprep.mubr.msk.f32.mxu1 %vm188_vm0, %v171_v17  ;;  %v289_v27 = vrot.slane %v173_v19, 1  ;;  %623 = vmatprep.subr.msk.mxu0 %vm195_vm2, %v550_v23  ;;  %v383_v32 = vrot.slane %v171_v17, 2 }
  0x13   : > { %v384_v33 = vrot.slane %v172_v18, 2  ;;  %656 = vmatpush3.bf16.msra.mxu1 %v653_v20  ;;  %v386_v40 = vrot.slane %v173_v19, 2 }
  0x14   : > { %v288_v24 = vsel %vm285_vm1, %v286_v21, %v287_v22  ;;  %v290_v34 = vsel %vm285_vm1, %v287_v22, %v289_v27  ;;  %606 = vmatprep.subr.msk.mxu1 %vm195_vm2, %v187_v30 }
  0x15   : > { %625 = vmatprep.mubr.msk.f32.mxu0 %vm188_vm0, %v288_v24  ;;  %624 = vmatpush3.msk.msra.mxu0 %vm195_vm2, %v550_v23  ;;  %v385_v38 = vsel %vm195_vm2, %v383_v32, %v384_v33  ;;  %v387_v42 = vsel %vm195_vm2, %v384_v33, %v386_v40 }
  0x16   : > { %670 = vmatprep.subr.bf16.mxu0 %v669_v31  ;;  %626 = vmatmul.mubr.msk.f32.vlgmr.msra.gmra.mrb[0].mxu0 %vm188_vm0, %v290_v34 }
  0x17   : > { %672 = vmatpush3.bf16.msra.mxu0 %v669_v31  ;;  %607 = vmatpush3.msk.msra.mxu1 %vm195_vm2, %v187_v30 }
  0x18   : > { %674 = vmatprep.subr.bf16.mxu0 %v673_v35  ;;  %609 = vmatmul.mubr.msk.f32.vlgmr.msra.gmra.mrb[0].mxu1 %vm188_vm0, %v172_v18 }
  0x19   : > { %642 = vmatprep.mubr.msk.f32.mxu0 %vm188_vm0, %v385_v38 }
  0x1b   : > { %676 = vmatpush3.bf16.msra.mxu0 %v673_v35 }
  0x1c   : > { %678 = vmatprep.subr.bf16.mxu0 %v677_v39 }
  0x1f   : > { %680 = vmatpush3.bf16.msra.mxu0 %v677_v39 }
  0x20   : > { %640 = vmatprep.subr.msk.mxu0 %vm195_vm2, %v560_v41 }
  0x23   : > { %641 = vmatpush3.msk.msra.mxu0 %vm195_vm2, %v560_v41 }
  0x24   : > { %643 = vmatmul.mubr.msk.f32.vlgmr.msra.gmra.mrb[0].mxu0 %vm188_vm0, %v387_v42 }
  0xeb   : > { %v610_v43 = vpop.f32.mrb[0].mxu1 }
  0xec   : > { %v265_v44 = vpop.f32.mrb[1].mxu1  ;;  %v275_v46 = vadd.f32 %v610_v43, %v540_v45 }
  0xed   : > { %v274_v47 = vadd.f32 %v540_v45, %v265_v44 }
  0xf7   : > { %v644_v48 = vpop.f32.mrb[0].mxu0 }
  0xf8   : > { %v682_v49 = vadd.f32 %v644_v48, %v275_v46  ;;  %v461_v50 = vpop.f32.mrb[1].mxu0 }
  0xf9   : > { %v684_v51 = vadd.f32 %v461_v50, %v274_v47 }
  0xfa   : > { %v473_v52 = vmax.f32 %v682_v49, 0.0 }
  0xfb   : > { %v472_v53 = vmax.f32 %v684_v51, 0.0 }
  0xfc   : > { %476 = vst.msk [vmem:[%s170_s15 + $0x8] sm:$0xff] %vm474_vm3, %v473_v52 }
  0xfd   : > { %475 = vst.msk [vmem:[%s170_s15] sm:$0xff] %vm474_vm3, %v472_v53 }
  0xfe PF: > { %s13_s12 = sadd.s32 1, %s702_s12  }
  0xff   : > { %p10_p4 = scmp.ge.s32.totalorder %s13_s12, 4  }
 0x101   :  { %12 = sbr.rel (!%p10_p4) target bundleno = 1 (0x1), region = 64 }

// kernel: sharednet_forward.9
= control target key start
LH: loop header
LB: loop body
LE: loop exit
PB: predicated region body
PF: predicated region fallthrough
CT: control target
= control target key end

     0   :  { %s752_s12 = smov 0   ;;  %s872_s0 = inlined_call_operand.vmem [shape: f32[2,18,72], index: 0, kind: input, shape index: {}]   ;;  %s873_s1 = inlined_call_operand.vmem [shape: f32[3,72,64], index: 1, kind: input, shape index: {}]   ;;  %s874_s2 = inlined_call_operand.vmem [shape: f32[1,64], index: 2, kind: input, shape index: {}]   ;;  %s875_s3 = inlined_call_operand.vmem [shape: f32[2,16,64], index: 3, kind: output, shape index: {}]  }
   0x1 LB: > { %s529_s13 = sadd.s32 4294967295, %s730_s12   ;;  %p533_p0 = scmp.ge.s32.totalorder %s730_s12, 1  ;;  %s730_s12 = sphi %s752_s12, %s13_s12  }
   0x2   : > { %p137_p1 = scmp.lt.s32.totalorder %s730_s12, 3 }
   0x4   : > { %p138_p2 = pnand %p533_p0, %p137_p1 }
   0x5   : > { %v540_v0 = vld [vmem:[%s873_s1 + $0x48] sm:$0xff] (!%p138_p2)  ;;  %v541_v1 = vld [vmem:[%s873_s1 + $0x50] sm:$0xff] (!%p138_p2)  ;;  %v542_v2 = vld [vmem:[%s873_s1 + $0x58] sm:$0xff] (!%p138_p2)  ;;  %p161_p3 = scmp.lt.s32.totalorder (!%p138_p2), %s529_s13, 1  ;;  %vm285_vm0 = vcmask (!%p138_p2), 1046528   ;;  %vm190_vm1 = vcmask (!%p138_p2), 588800  }
   0x6   : > { %141 = sbr.rel (%p138_p2) target bundleno = 262 (0x106), region = 32  ;;  %v677_v3 = vpack.c.bf16 (!%p138_p2), %v541_v1, %v540_v0  ;;  %v543_v4 = vld [vmem:[%s873_s1 + $0x60] sm:$0xff] (!%p138_p2)  ;;  %v544_v6 = vld [vmem:[%s873_s1 + $0x68] sm:$0xff] (!%p138_p2)  ;;  %v545_v7 = vld [vmem:[%s873_s1 + $0x70] sm:$0xff] (!%p138_p2)  ;;  %vm382_vm2 = vcmask (!%p138_p2), 1045504   ;;  %vm471_vm3 = vcmask (!%p138_p2), 523264  }
   0x7   : > { %v681_v5 = vpack.c.bf16 (!%p138_p2), %v543_v4, %v542_v2  ;;  %v181_v8 = vld [vmem:[%s873_s1] sm:$0xff] (!%p138_p2)  ;;  %v182_v9 = vld [vmem:[%s873_s1 + $0x8] sm:$0xff] (!%p138_p2)  ;;  %v183_v11 = vld [vmem:[%s873_s1 + $0x10] sm:$0xff] (!%p138_p2)  ;;  %v685_v13 = vpack.c.bf16 (!%p138_p2), %v545_v7, %v544_v6 }
   0x8   : > { %678 = vmatprep.subr.bf16.mxu0 (!%p138_p2), %v677_v3  ;;  %v661_v10 = vpack.c.bf16 (!%p138_p2), %v182_v9, %v181_v8  ;;  %v184_v12 = vld [vmem:[%s873_s1 + $0x18] sm:$0xff] (!%p138_p2)  ;;  %v185_v15 = vld [vmem:[%s873_s1 + $0x20] sm:$0xff] (!%p138_p2)  ;;  %v186_v18 = vld [vmem:[%s873_s1 + $0x28] sm:$0xff] (!%p138_p2) }
   0x9   : > { %680 = vmatpush3.bf16.msra.mxu0 (!%p138_p2), %v677_v3  ;;  %v665_v14 = vpack.c.bf16 (!%p138_p2), %v184_v12, %v183_v11  ;;  %v546_v16 = vld [vmem:[%s873_s1 + $0x78] sm:$0xff] (!%p138_p2)  ;;  %v547_v17 = vld [vmem:[%s873_s1 + $0x80] sm:$0xff] (!%p138_p2)  ;;  %v669_v23 = vpack.c.bf16 (!%p138_p2), %v186_v18, %v185_v15  ;;  %v187_v25 = vld [vmem:[%s873_s1 + $0x30] sm:$0xff] (!%p138_p2) }
   0xa   : > { %682 = vmatprep.subr.bf16.mxu0 (!%p138_p2), %v681_v5  ;;  %662 = vmatprep.subr.bf16.mxu1 (!%p138_p2), %v661_v10  ;;  %v689_v24 = vpack.c.bf16 (!%p138_p2), %v547_v17, %v546_v16  ;;  %v188_v26 = vld [vmem:[%s873_s1 + $0x38] sm:$0xff] (!%p138_p2)  ;;  %v548_v30 = vld [vmem:[%s873_s1 + $0x88] sm:$0xff] (!%p138_p2)  ;;  %v551_v31 = vld [vmem:[%s873_s1 + $0x90] sm:$0xff] (!%p138_p2) }
   0xb   : > { %664 = vmatpush3.bf16.msra.mxu1 (!%p138_p2), %v661_v10  ;;  %v673_v29 = vpack.c.bf16 (!%p138_p2), %v188_v26, %v187_v25  ;;  %v552_v32 = vld [vmem:[%s873_s1 + $0x98] sm:$0xff] (!%p138_p2)  ;;  %v553_v36 = vld [vmem:[%s873_s1 + $0xa0] sm:$0xff] (!%p138_p2)  ;;  %v554_v37 = vld [vmem:[%s873_s1 + $0xa8] sm:$0xff] (!%p138_p2) }
   0xc   : > { %666 = vmatprep.subr.bf16.mxu1 (!%p138_p2), %v665_v14  ;;  %v693_v38 = vpack.c.bf16 (!%p138_p2), %v552_v32, %v551_v31  ;;  %v189_v39 = vld [vmem:[%s873_s1 + $0x40] sm:$0xff] (!%p138_p2)  ;;  %v697_v41 = vpack.c.bf16 (!%p138_p2), %v554_v37, %v553_v36  ;;  %v555_v43 = vld [vmem:[%s873_s1 + $0xb0] sm:$0xff] (!%p138_p2)  ;;  %v556_v44 = vld [vmem:[%s873_s1 + $0xb8] sm:$0xff] (!%p138_p2) }
   0xd   : > { %s877_s13 = smov (!%p161_p3, %s529_s13), 1  ;;  %684 = vmatpush3.bf16.msra.mxu0 %v681_v5  ;;  %v701_v45 = vpack.c.bf16 %v556_v44, %v555_v43  ;;  %v557_v46 = vld [vmem:[%s873_s1 + $0xc0] sm:$0xff]  ;;  %v558_v47 = vld [vmem:[%s873_s1 + $0xc8] sm:$0xff]  ;;  %v559_v50 = vld [vmem:[%s873_s1 + $0xd0] sm:$0xff] }
   0xe   : > { %s715_s30 = smul.u32 24, %s877_s13  ;;  %686 = vmatprep.subr.bf16.mxu0 %v685_v13  ;;  %v705_v48 = vpack.c.bf16 %v558_v47, %v557_v46  ;;  %v537_v54 = vld [vmem:[%s874_s2] ss:$0 sm:$0xff]  ;;  %s564_s24 = sshll.u32 %s877_s13, 4 }
   0xf   : > { %668 = vmatpush3.bf16.msra.mxu1 %v665_v14  ;;  %s170_s27 = scalar_lea.vmem %s875_s3, %s564_s24 }
  0x10   : > { %s165_s18 = scalar_lea.vmem %s872_s0, %s715_s30  ;;  %670 = vmatprep.subr.bf16.mxu1 %v669_v23 }
  0x11   : > { %v171_v19 = vld [vmem:[%s165_s18] sm:$0xff]  ;;  %v808_v20 = vld [vmem:[%s165_s18 + $0x8] sm:$0xff]  ;;  %v173_v28 = vld [vmem:[%s165_s18 + $0x10] sm:$0x3]  ;;  %688 = vmatpush3.bf16.msra.mxu0 %v685_v13 }
  0x12   : > { %v286_v21 = vrot.slane %v171_v19, 1  ;;  %v287_v22 = vrot.slane %v808_v20, 1  ;;  %616 = vmatprep.mubr.msk.f32.mxu1 %vm190_vm1, %v171_v19  ;;  %690 = vmatprep.subr.bf16.mxu0 %v689_v24  ;;  %v289_v33 = vrot.slane %v173_v28, 1  ;;  %v383_v34 = vrot.slane %v171_v19, 2 }
  0x13   : > { %672 = vmatpush3.bf16.msra.mxu1 %v669_v23  ;;  %v384_v35 = vrot.slane %v808_v20, 2  ;;  %v386_v49 = vrot.slane %v173_v28, 2 }
  0x14   : > { %v288_v27 = vsel %vm285_vm0, %v286_v21, %v287_v22  ;;  %674 = vmatprep.subr.bf16.mxu1 %v673_v29  ;;  %v290_v40 = vsel %vm285_vm0, %v287_v22, %v289_v33 }
  0x15   : > { %637 = vmatprep.mubr.msk.f32.mxu0 %vm190_vm1, %v288_v27  ;;  %692 = vmatpush3.bf16.msra.mxu0 %v689_v24  ;;  %v385_v42 = vsel %vm382_vm2, %v383_v34, %v384_v35  ;;  %v387_v51 = vsel %vm382_vm2, %v384_v35, %v386_v49 }
  0x16   : > { %635 = vmatprep.subr.mxu0 %v548_v30 }
  0x17   : > { %676 = vmatpush3.bf16.msra.mxu1 %v673_v29 }
  0x18   : > { %614 = vmatprep.subr.mxu1 %v189_v39 }
  0x19   : > { %636 = vmatpush3.msra.mxu0 %v548_v30 }
  0x1a   : > { %694 = vmatprep.subr.bf16.mxu0 %v693_v38  ;;  %638 = vmatmul.mubr.msk.f32.vlgmr.msra.gmra.mrb[0].mxu0 %vm190_vm1, %v290_v40 }
  0x1b   : > { %696 = vmatpush3.bf16.msra.mxu0 %v693_v38  ;;  %658 = vmatprep.mubr.msk.f32.mxu0 %vm190_vm1, %v385_v42 }
  0x1c   : > { %698 = vmatprep.subr.bf16.mxu0 %v697_v41  ;;  %615 = vmatpush3.msra.mxu1 %v189_v39 }
  0x1d   : > { %617 = vmatmul.mubr.msk.f32.vlgmr.msra.gmra.mrb[0].mxu1 %vm190_vm1, %v808_v20 }
  0x1f   : > { %700 = vmatpush3.bf16.msra.mxu0 %v697_v41 }
  0x20   : > { %702 = vmatprep.subr.bf16.mxu0 %v701_v45 }
  0x23   : > { %704 = vmatpush3.bf16.msra.mxu0 %v701_v45 }
  0x24   : > { %706 = vmatprep.subr.bf16.mxu0 %v705_v48 }
  0x27   : > { %708 = vmatpush3.bf16.msra.mxu0 %v705_v48 }
  0x28   : > { %656 = vmatprep.subr.mxu0 %v559_v50 }
  0x2b   : > { %657 = vmatpush3.msra.mxu0 %v559_v50 }
  0x2c   : > { %659 = vmatmul.mubr.msk.f32.vlgmr.msra.gmra.mrb[0].mxu0 %vm190_vm1, %v387_v51 }
  0xf0   : > { %v618_v52 = vpop.f32.mrb[0].mxu1 }
  0xf1   : > { %v263_v53 = vpop.f32.mrb[1].mxu1  ;;  %v273_v55 = vadd.f32 %v618_v52, %v537_v54 }
  0xf2   : > { %v272_v56 = vadd.f32 %v537_v54, %v263_v53 }
  0xff   : > { %v660_v57 = vpop.f32.mrb[0].mxu0 }
 0x100   : > { %v710_v58 = vadd.f32 %v660_v57, %v273_v55  ;;  %v458_v59 = vpop.f32.mrb[1].mxu0 }
 0x101   : > { %v712_v60 = vadd.f32 %v458_v59, %v272_v56 }
 0x102   : > { %v470_v61 = vmax.f32 %v710_v58, 0.0 }
 0x103   : > { %v469_v62 = vmax.f32 %v712_v60, 0.0 }
 0x104   : > { %473 = vst.msk [vmem:[%s170_s27 + $0x8] sm:$0xff] %vm471_vm3, %v470_v61 }
 0x105   : > { %472 = vst.msk [vmem:[%s170_s27] sm:$0xff] %vm471_vm3, %v469_v62 }
 0x106 PF: > { %s13_s12 = sadd.s32 1, %s730_s12  }
 0x107   : > { %p10_p4 = scmp.ge.s32.totalorder %s13_s12, 4  }
 0x109   :  { %12 = sbr.rel (!%p10_p4) target bundleno = 1 (0x1), region = 64 }

// kernel: tile.53
= control target key start
LH: loop header
LB: loop body
LE: loop exit
PB: predicated region body
PF: predicated region fallthrough
CT: control target
= control target key end

     0   :  { %s22_s0 = inlined_call_operand.vmem [shape: f32[8], index: 0, kind: input, shape index: {}]   ;;  %s23_s1 = inlined_call_operand.vmem [shape: f32[8,8], index: 1, kind: output, shape index: {}]  }
   0x1   :  { %v4_v0 = vld [vmem:[%s22_s0] ss:$0 sm:$0xff] }
   0x2   :  { %5 = vst [vmem:[%s23_s1] sm:$0xff] %v4_v0 }

// kernel: tile.54
= control target key start
LH: loop header
LB: loop body
LE: loop exit
PB: predicated region body
PF: predicated region fallthrough
CT: control target
= control target key end

     0   :  { %s67_s10 = smov 56   ;;  %s68_s11 = smov 40   ;;  %vm3_vm0 = vcmask 64512   ;;  %vm9_vm1 = vcmask 523712   ;;  %vm15_vm2 = vcmask 458112   ;;  %vm21_vm3 = vcmask 392512   ;;  %s111_s0 = inlined_call_operand.vmem [shape: f32[8,8], index: 0, kind: input, shape index: {}]   ;;  %s112_s1 = inlined_call_operand.vmem [shape: f32[1,64], index: 1, kind: output, shape index: {}]  }
   0x1   :  { %v53_v0 = vld [vmem:[%s111_s0 + $0x7] sm:$0x1]   ;;  %v55_v1 = vld [vmem:[%s111_s0 + $0x5] sm:$0x1]   ;;  %v54_v2 = vld [vmem:[%s111_s0 + $0x6] sm:$0x1]  }
   0x2   :  { %7 = vrot.lane.b32.xlu0 %v53_v0, %s67_s10  ;;  %19 = vrot.lane.b32.xlu1 %v55_v1, %s68_s11  ;;  %v56_v3 = vld [vmem:[%s111_s0 + $0x4] sm:$0x1]   ;;  %v2_v4 = vld [vmem:[%s111_s0] sm:$0x1]   ;;  %s69_s18 = smov 48   ;;  %s70_s19 = smov 32  }
   0x3   :  { %4 = vst.msk [vmem:[#allocation0] sm:$0x1] %vm3_vm0, %v2_v4   ;;  %v57_v5 = vld [vmem:[%s111_s0 + $0x3] sm:$0x1]   ;;  %v58_v6 = vld [vmem:[%s111_s0 + $0x2] sm:$0x1]  }
   0x4   :  { %s71_s24 = smov 24   ;;  %s72_s25 = smov 16   ;;  %v59_v7 = vld [vmem:[%s111_s0 + $0x1] sm:$0x1]   ;;  %vm27_vm4 = vcmask 326912   ;;  %vm33_vm5 = vcmask 261312  }
   0x5   :  { %s73_s0 = smov 8   ;;  %vm39_vm6 = vcmask 195712   ;;  %vm45_vm7 = vcmask 130112  }
   0x6   :  { %13 = vrot.lane.b32.xlu0 %v54_v2, %s69_s18  ;;  %25 = vrot.lane.b32.xlu1 %v56_v3, %s70_s19 }
   0xa   :  { %31 = vrot.lane.b32.xlu0 %v57_v5, %s71_s24  ;;  %37 = vrot.lane.b32.xlu1 %v58_v6, %s72_s25 }
   0xe   :  { %43 = vrot.lane.b32.xlu0 %v59_v7, %s73_s0 }
  0x74   :  { %v8_v8 = vpop.permute.xlu0 %7   ;;  %v20_v9 = vpop.permute.xlu1 %19  }
  0x75   :  { %10 = vst.msk [vmem:[#allocation0] sm:$0x1] %vm9_vm1, %v8_v8  }
  0x78   :  { %v14_v10 = vpop.permute.xlu0 %13   ;;  %v26_v11 = vpop.permute.xlu1 %25  }
  0x79   :  { %16 = vst.msk [vmem:[#allocation0] sm:$0x1] %vm15_vm2, %v14_v10  }
  0x7a   :  { %22 = vst.msk [vmem:[#allocation0] sm:$0x1] %vm21_vm3, %v20_v9  }
  0x7b   :  { %28 = vst.msk [vmem:[#allocation0] sm:$0x1] %vm27_vm4, %v26_v11  }
  0x7c   :  { %v32_v12 = vpop.permute.xlu0 %31   ;;  %v38_v13 = vpop.permute.xlu1 %37  }
  0x7d   :  { %34 = vst.msk [vmem:[#allocation0] sm:$0x1] %vm33_vm5, %v32_v12  }
  0x7e   :  { %40 = vst.msk [vmem:[#allocation0] sm:$0x1] %vm39_vm6, %v38_v13  }
  0x80   :  { %v44_v14 = vpop.permute.xlu0 %43  }
  0x81   :  { %46 = vst.msk [vmem:[#allocation0] sm:$0x1] %vm45_vm7, %v44_v14  }
  0x88   :  { %v50_v15 = vld [vmem:[#allocation0] sm:$0x1] }
  0x89   :  { %52 = vst [vmem:[%s112_s1] sm:$0x1] %v50_v15 }

// kernel: sharednet_forward.10
= control target key start
LH: loop header
LB: loop body
LE: loop exit
PB: predicated region body
PF: predicated region fallthrough
CT: control target
= control target key end

     0   :  { %s627_s12 = smov 0   ;;  %s702_s0 = inlined_call_operand.vmem [shape: f32[2,10,40], index: 0, kind: input, shape index: {}]   ;;  %s703_s1 = inlined_call_operand.vmem [shape: f32[3,40,64], index: 1, kind: input, shape index: {}]   ;;  %s704_s2 = inlined_call_operand.vmem [shape: f32[1,64], index: 2, kind: input, shape index: {}]   ;;  %s705_s3 = inlined_call_operand.vmem [shape: f32[2,8,64], index: 3, kind: output, shape index: {}]  }
   0x1 LB: > { %s481_s13 = sadd.s32 4294967295, %s602_s12   ;;  %p485_p0 = scmp.ge.s32.totalorder %s602_s12, 1  ;;  %s602_s12 = sphi %s627_s12, %s13_s12  }
   0x2   : > { %p137_p1 = scmp.lt.s32.totalorder %s602_s12, 3 }
   0x4   : > { %p138_p2 = pnand %p485_p0, %p137_p1 }
   0x5   : > { %v491_v0 = vld [vmem:[%s703_s1 + $0x28] sm:$0xff] (!%p138_p2)  ;;  %v492_v1 = vld [vmem:[%s703_s1 + $0x30] sm:$0xff] (!%p138_p2)  ;;  %v493_v2 = vld [vmem:[%s703_s1 + $0x38] sm:$0xff] (!%p138_p2)  ;;  %v604_v3 = vmov (!%p138_p2), 0.0|0.0   ;;  %p160_p3 = scmp.lt.s32.totalorder (!%p138_p2), %s481_s13, 1  ;;  %vm605_vm0 = vmmov (!%p138_p2), 0  }
   0x6   : > { %141 = sbr.rel (%p138_p2) target bundleno = 247 (0xf7), region = 32  ;;  %569 = vmatprep.subr.bf16.mxu0 (!%p138_p2), %v604_v3  ;;  %v570_v4 = vpack.c.bf16 (!%p138_p2), %v492_v1, %v491_v0  ;;  %v494_v5 = vld [vmem:[%s703_s1 + $0x40] sm:$0xff] (!%p138_p2)  ;;  %563 = vmatprep.subr.bf16.mxu1 (!%p138_p2), %v604_v3  ;;  %v179_v7 = vld [vmem:[%s703_s1 + $0x8] sm:$0xff] (!%p138_p2)  ;;  %v606_v9 = vmov (!%p138_p2), 0.0   ;;  %v180_v11 = vld [vmem:[%s703_s1 + $0x10] sm:$0xff] (!%p138_p2)  ;;  %vm265_vm1 = vcmask (!%p138_p2), 1046528  }
   0x7   : > { %v178_v6 = vld [vmem:[%s703_s1] sm:$0xff] (!%p138_p2)  ;;  %547 = vmatprep.mubr.msk.f32.mxu0 (!%p138_p2), %vm605_vm0, %v606_v9  ;;  %534 = vmatprep.mubr.msk.f32.mxu1 (!%p138_p2), %vm605_vm0, %v606_v9  ;;  %v573_v10 = vpack.c.bf16 (!%p138_p2), %v494_v5, %v493_v2  ;;  %v181_v12 = vld [vmem:[%s703_s1 + $0x18] sm:$0xff] (!%p138_p2)  ;;  %v497_v14 = vld [vmem:[%s703_s1 + $0x50] sm:$0xff] (!%p138_p2)  ;;  %vm183_vm2 = vcmask (!%p138_p2), 326656   ;;  %vm348_vm3 = vcmask (!%p138_p2), 1045504   ;;  %vm426_vm4 = vcmask (!%p138_p2), 523264  }
   0x8   : > { %v564_v8 = vpack.c.bf16 (!%p138_p2), %v179_v7, %v178_v6  ;;  %571 = vmatpush3.bf16.msra.mxu0 (!%p138_p2), %v570_v4  ;;  %v567_v13 = vpack.c.bf16 (!%p138_p2), %v181_v12, %v180_v11  ;;  %v498_v15 = vld [vmem:[%s703_s1 + $0x58] sm:$0xff] (!%p138_p2)  ;;  %v495_v18 = vld [vmem:[%s703_s1 + $0x48] sm:$0xff] (!%p138_p2)  ;;  %v499_v23 = vld [vmem:[%s703_s1 + $0x60] sm:$0xff] (!%p138_p2) }
   0x9   : > { %572 = vmatprep.subr.bf16.mxu0 (!%p138_p2), %v604_v3  ;;  %v576_v21 = vpack.c.bf16 (!%p138_p2), %v498_v15, %v497_v14  ;;  %v500_v24 = vld [vmem:[%s703_s1 + $0x68] sm:$0xff] (!%p138_p2)  ;;  %v182_v25 = vld [vmem:[%s703_s1 + $0x20] sm:$0xff] (!%p138_p2)  ;;  %v501_v29 = vld [vmem:[%s703_s1 + $0x70] sm:$0xff] (!%p138_p2) }
   0xa   : > { %565 = vmatpush3.bf16.msra.mxu1 (!%p138_p2), %v564_v8  ;;  %v579_v26 = vpack.c.bf16 (!%p138_p2), %v500_v24, %v499_v23  ;;  %v489_v33 = vld [vmem:[%s704_s2] ss:$0 sm:$0xff] (!%p138_p2) }
   0xb   : > { %566 = vmatprep.subr.bf16.mxu1 (!%p138_p2), %v604_v3 }
   0xc   : > { %574 = vmatpush3.bf16.msra.mxu0 (!%p138_p2), %v573_v10 }
   0xd   : > { %s707_s13 = smov (!%p160_p3, %s481_s13), 1  ;;  %545 = vmatprep.subr.mxu0 %v606_v9 }
   0xe   : > { %s505_s30 = sshll.u32 %s707_s13, 4  ;;  %568 = vmatpush3.bf16.msra.mxu1 %v567_v13  ;;  %s488_s25 = sshll.u32 %s707_s13, 3 }
   0xf   : > { %s164_s6 = scalar_lea.vmem %s702_s0, %s505_s30  ;;  %532 = vmatprep.subr.mxu1 %v606_v9  ;;  %s168_s28 = scalar_lea.vmem %s705_s3, %s488_s25 }
  0x10   : > { %v169_v16 = vld [vmem:[%s164_s6] sm:$0xff]  ;;  %v170_v17 = vld [vmem:[%s164_s6 + $0x8] sm:$0x3]  ;;  %546 = vmatpush3.msra.mxu0 %v495_v18 }
  0x11   : > { %v266_v19 = vrot.slane %v169_v16, 1  ;;  %v267_v20 = vrot.slane %v170_v17, 1  ;;  %575 = vmatprep.subr.bf16.mxu0 %v604_v3  ;;  %v350_v27 = vrot.slane %v170_v17, 2  ;;  %v349_v28 = vrot.slane %v169_v16, 2 }
  0x12   : > { %533 = vmatpush3.msra.mxu1 %v182_v25 }
  0x13   : > { %v268_v22 = vsel %vm265_vm1, %v266_v19, %v267_v20  ;;  %535 = vmatmul.mubr.msk.f32.vlgmr.msra.gmra.mrb[0].mxu1 %vm183_vm2, %v169_v16  ;;  %v351_v30 = vsel %vm348_vm3, %v349_v28, %v350_v27 }
  0x14   : > { %548 = vmatmul.mubr.msk.f32.vlgmr.msra.gmra.mrb[0].mxu0 %vm183_vm2, %v268_v22 }
  0x15   : > { %577 = vmatpush3.bf16.msra.mxu0 %v576_v21  ;;  %560 = vmatprep.mubr.msk.f32.mxu0 %vm605_vm0, %v606_v9 }
  0x16   : > { %578 = vmatprep.subr.bf16.mxu0 %v604_v3 }
  0x19   : > { %580 = vmatpush3.bf16.msra.mxu0 %v579_v26 }
  0x1a   : > { %558 = vmatprep.subr.mxu0 %v606_v9 }
  0x1d   : > { %559 = vmatpush3.msra.mxu0 %v501_v29 }
  0x1e   : > { %561 = vmatmul.mubr.msk.f32.vlgmr.msra.gmra.mrb[0].mxu0 %vm183_vm2, %v351_v30 }
  0xe6   : > { %v253_v31 = vpop.f32.mrb[0].mxu1 }
  0xe7   : > { %v536_v32 = vpop.f32.mrb[1].mxu1  ;;  %v257_v34 = vadd.f32 %v489_v33, %v253_v31 }
  0xf1   : > { %v420_v35 = vpop.f32.mrb[0].mxu0 }
  0xf2   : > { %v582_v36 = vadd.f32 %v420_v35, %v257_v34  ;;  %v562_v37 = vpop.f32.mrb[1].mxu0 }
  0xf4   : > { %v425_v38 = vmax.f32 %v582_v36, 0.0 }
  0xf6   : > { %427 = vst.msk [vmem:[%s168_s28] sm:$0xff] %vm426_vm4, %v425_v38 }
  0xf7 PF: > { %s13_s12 = sadd.s32 1, %s602_s12  }
  0xf8   : > { %p10_p4 = scmp.ge.s32.totalorder %s13_s12, 4  }
  0xfa   :  { %12 = sbr.rel (!%p10_p4) target bundleno = 1 (0x1), region = 64 }

// kernel: sharednet_forward.11
= control target key start
LH: loop header
LB: loop body
LE: loop exit
PB: predicated region body
PF: predicated region fallthrough
CT: control target
= control target key end

     0   :  { %s724_s12 = smov 0   ;;  %s862_s0 = inlined_call_operand.vmem [shape: f32[2,10,80], index: 0, kind: input, shape index: {}]   ;;  %s863_s1 = inlined_call_operand.vmem [shape: f32[3,80,64], index: 1, kind: input, shape index: {}]   ;;  %s864_s2 = inlined_call_operand.vmem [shape: f32[1,64], index: 2, kind: input, shape index: {}]   ;;  %s865_s3 = inlined_call_operand.vmem [shape: f32[2,8,64], index: 3, kind: output, shape index: {}]  }
   0x1 LB: > { %s496_s13 = sadd.s32 4294967295, %s699_s12   ;;  %p500_p0 = scmp.ge.s32.totalorder %s699_s12, 1  ;;  %s699_s12 = sphi %s724_s12, %s13_s12  }
   0x2   : > { %p137_p1 = scmp.lt.s32.totalorder %s699_s12, 3 }
   0x4   : > { %p138_p2 = pnand %p500_p0, %p137_p1 }
   0x5   : > { %v506_v0 = vld [vmem:[%s863_s1 + $0x50] sm:$0xff] (!%p138_p2)  ;;  %v507_v1 = vld [vmem:[%s863_s1 + $0x58] sm:$0xff] (!%p138_p2)  ;;  %v508_v2 = vld [vmem:[%s863_s1 + $0x60] sm:$0xff] (!%p138_p2)  ;;  %v701_v3 = vmov (!%p138_p2), 0.0|0.0   ;;  %p160_p3 = scmp.lt.s32.totalorder (!%p138_p2), %s496_s13, 1  ;;  %vm702_vm0 = vmmov (!%p138_p2), 0  }
   0x6   : > { %141 = sbr.rel (%p138_p2) target bundleno = 264 (0x108), region = 32  ;;  %648 = vmatprep.subr.bf16.mxu0 (!%p138_p2), %v701_v3  ;;  %v649_v4 = vpack.c.bf16 (!%p138_p2), %v507_v1, %v506_v0  ;;  %v509_v5 = vld [vmem:[%s863_s1 + $0x68] sm:$0xff] (!%p138_p2)  ;;  %633 = vmatprep.subr.bf16.mxu1 (!%p138_p2), %v701_v3  ;;  %v703_v6 = vmov (!%p138_p2), 0.0   ;;  %v178_v8 = vld [vmem:[%s863_s1] sm:$0xff] (!%p138_p2)  ;;  %v510_v10 = vld [vmem:[%s863_s1 + $0x70] sm:$0xff] (!%p138_p2)  ;;  %vm275_vm1 = vcmask (!%p138_p2), 1046528  }
   0x7   : > { %607 = vmatprep.mubr.msk.f32.mxu0 (!%p138_p2), %vm702_vm0, %v703_v6  ;;  %584 = vmatprep.mubr.msk.f32.mxu1 (!%p138_p2), %vm702_vm0, %v703_v6  ;;  %v652_v7 = vpack.c.bf16 (!%p138_p2), %v509_v5, %v508_v2  ;;  %v179_v9 = vld [vmem:[%s863_s1 + $0x8] sm:$0xff] (!%p138_p2)  ;;  %v511_v11 = vld [vmem:[%s863_s1 + $0x78] sm:$0xff] (!%p138_p2)  ;;  %v180_v13 = vld [vmem:[%s863_s1 + $0x10] sm:$0xff] (!%p138_p2)  ;;  %vm188_vm2 = vcmask (!%p138_p2), 654336   ;;  %vm363_vm3 = vcmask (!%p138_p2), 1045504   ;;  %vm441_vm4 = vcmask (!%p138_p2), 523264  }
   0x8   : > { %650 = vmatpush3.bf16.msra.mxu0 (!%p138_p2), %v649_v4  ;;  %v634_v12 = vpack.c.bf16 (!%p138_p2), %v179_v9, %v178_v8  ;;  %v181_v14 = vld [vmem:[%s863_s1 + $0x18] sm:$0xff] (!%p138_p2)  ;;  %v655_v16 = vpack.c.bf16 (!%p138_p2), %v511_v11, %v510_v10  ;;  %v182_v17 = vld [vmem:[%s863_s1 + $0x20] sm:$0xff] (!%p138_p2)  ;;  %v183_v18 = vld [vmem:[%s863_s1 + $0x28] sm:$0xff] (!%p138_p2) }
   0x9   : > { %651 = vmatprep.subr.bf16.mxu0 (!%p138_p2), %v701_v3  ;;  %v637_v15 = vpack.c.bf16 (!%p138_p2), %v181_v14, %v180_v13  ;;  %v512_v19 = vld [vmem:[%s863_s1 + $0x80] sm:$0xff] (!%p138_p2)  ;;  %v513_v20 = vld [vmem:[%s863_s1 + $0x88] sm:$0xff] (!%p138_p2)  ;;  %v640_v21 = vpack.c.bf16 (!%p138_p2), %v183_v18, %v182_v17  ;;  %v514_v23 = vld [vmem:[%s863_s1 + $0x90] sm:$0xff] (!%p138_p2) }
   0xa   : > { %635 = vmatpush3.bf16.msra.mxu1 (!%p138_p2), %v634_v12  ;;  %v658_v22 = vpack.c.bf16 (!%p138_p2), %v513_v20, %v512_v19  ;;  %v184_v24 = vld [vmem:[%s863_s1 + $0x30] sm:$0xff] (!%p138_p2)  ;;  %v185_v25 = vld [vmem:[%s863_s1 + $0x38] sm:$0xff] (!%p138_p2)  ;;  %v186_v33 = vld [vmem:[%s863_s1 + $0x40] sm:$0xff] (!%p138_p2) }
   0xb   : > { %636 = vmatprep.subr.bf16.mxu1 (!%p138_p2), %v701_v3  ;;  %v515_v26 = vld [vmem:[%s863_s1 + $0x98] sm:$0xff] (!%p138_p2)  ;;  %v643_v29 = vpack.c.bf16 (!%p138_p2), %v185_v25, %v184_v24  ;;  %v187_v34 = vld [vmem:[%s863_s1 + $0x48] sm:$0xff] (!%p138_p2)  ;;  %v517_v35 = vld [vmem:[%s863_s1 + $0xa0] sm:$0xff] (!%p138_p2) }
   0xc   : > { %653 = vmatpush3.bf16.msra.mxu0 (!%p138_p2), %v652_v7  ;;  %v661_v30 = vpack.c.bf16 (!%p138_p2), %v515_v26, %v514_v23  ;;  %v518_v36 = vld [vmem:[%s863_s1 + $0xa8] sm:$0xff] (!%p138_p2)  ;;  %v646_v37 = vpack.c.bf16 (!%p138_p2), %v187_v34, %v186_v33  ;;  %v519_v40 = vld [vmem:[%s863_s1 + $0xb0] sm:$0xff] (!%p138_p2)  ;;  %v520_v41 = vld [vmem:[%s863_s1 + $0xb8] sm:$0xff] (!%p138_p2) }
   0xd   : > { %s867_s13 = smov (!%p160_p3, %s496_s13), 1  ;;  %654 = vmatprep.subr.bf16.mxu0 %v701_v3  ;;  %v664_v39 = vpack.c.bf16 %v518_v36, %v517_v35  ;;  %v667_v42 = vpack.c.bf16 %v520_v41, %v519_v40  ;;  %v521_v43 = vld [vmem:[%s863_s1 + $0xc0] sm:$0xff]  ;;  %v522_v44 = vld [vmem:[%s863_s1 + $0xc8] sm:$0xff]  ;;  %v523_v46 = vld [vmem:[%s863_s1 + $0xd0] sm:$0xff] }
   0xe   : > { %s530_s7 = sshll.u32 %s867_s13, 4  ;;  %638 = vmatpush3.bf16.msra.mxu1 %v637_v15  ;;  %v670_v45 = vpack.c.bf16 %v522_v44, %v521_v43  ;;  %v524_v47 = vld [vmem:[%s863_s1 + $0xd8] sm:$0xff]  ;;  %v525_v49 = vld [vmem:[%s863_s1 + $0xe0] sm:$0xff]  ;;  %v526_v50 = vld [vmem:[%s863_s1 + $0xe8] sm:$0xff]  ;;  %s503_s30 = sshll.u32 %s867_s13, 3 }
   0xf   : > { %s164_s20 = scalar_lea.vmem %s862_s0, %s530_s7  ;;  %639 = vmatprep.subr.bf16.mxu1 %v701_v3  ;;  %v673_v48 = vpack.c.bf16 %v524_v47, %v523_v46  ;;  %v676_v52 = vpack.c.bf16 %v526_v50, %v525_v49  ;;  %v504_v57 = vld [vmem:[%s864_s2] ss:$0 sm:$0xff]  ;;  %s168_s6 = scalar_lea.vmem %s865_s3, %s503_s30 }
  0x10   : > { %656 = vmatpush3.bf16.msra.mxu0 %v655_v16  ;;  %v169_v27 = vld [vmem:[%s164_s20] sm:$0xff]  ;;  %v170_v28 = vld [vmem:[%s164_s20 + $0x8] sm:$0x3] }
  0x11   : > { %657 = vmatprep.subr.bf16.mxu0 %v701_v3  ;;  %v276_v31 = vrot.slane %v169_v27, 1  ;;  %v277_v32 = vrot.slane %v170_v28, 1  ;;  %v365_v51 = vrot.slane %v170_v28, 2  ;;  %v364_v53 = vrot.slane %v169_v27, 2 }
  0x12   : > { %641 = vmatpush3.bf16.msra.mxu1 %v640_v21 }
  0x13   : > { %642 = vmatprep.subr.bf16.mxu1 %v701_v3  ;;  %v278_v38 = vsel %vm275_vm1, %v276_v31, %v277_v32  ;;  %v366_v54 = vsel %vm363_vm3, %v364_v53, %v365_v51 }
  0x14   : > { %659 = vmatpush3.bf16.msra.mxu0 %v658_v22 }
  0x15   : > { %660 = vmatprep.subr.bf16.mxu0 %v701_v3 }
  0x16   : > { %644 = vmatpush3.bf16.msra.mxu1 %v643_v29 }
  0x17   : > { %645 = vmatprep.subr.bf16.mxu1 %v701_v3 }
  0x18   : > { %662 = vmatpush3.bf16.msra.mxu0 %v661_v30 }
  0x19   : > { %663 = vmatprep.subr.bf16.mxu0 %v701_v3 }
  0x1a   : > { %647 = vmatpush3.bf16.msra.mxu1 %v646_v37 }
  0x1b   : > { %608 = vmatmul.mubr.msk.f32.vlgmr.msra.gmra.mrb[0].mxu0 %vm188_vm2, %v278_v38 }
  0x1c   : > { %665 = vmatpush3.bf16.msra.mxu0 %v664_v39  ;;  %630 = vmatprep.mubr.msk.f32.mxu0 %vm702_vm0, %v703_v6 }
  0x1d   : > { %666 = vmatprep.subr.bf16.mxu0 %v701_v3  ;;  %585 = vmatmul.mubr.msk.f32.vlgmr.msra.gmra.mrb[0].mxu1 %vm188_vm2, %v169_v27 }
  0x20   : > { %668 = vmatpush3.bf16.msra.mxu0 %v667_v42 }
  0x21   : > { %669 = vmatprep.subr.bf16.mxu0 %v701_v3 }
  0x24   : > { %671 = vmatpush3.bf16.msra.mxu0 %v670_v45 }
  0x25   : > { %672 = vmatprep.subr.bf16.mxu0 %v701_v3 }
  0x28   : > { %674 = vmatpush3.bf16.msra.mxu0 %v673_v48 }
  0x29   : > { %675 = vmatprep.subr.bf16.mxu0 %v701_v3 }
  0x2c   : > { %677 = vmatpush3.bf16.msra.mxu0 %v676_v52 }
  0x2f   : > { %631 = vmatmul.mubr.msk.f32.vlgmr.msra.gmra.mrb[0].mxu0 %vm188_vm2, %v366_v54 }
  0xf0   : > { %v258_v55 = vpop.f32.mrb[0].mxu1 }
  0xf1   : > { %v586_v56 = vpop.f32.mrb[1].mxu1  ;;  %v262_v58 = vadd.f32 %v504_v57, %v258_v55 }
 0x102   : > { %v435_v59 = vpop.f32.mrb[0].mxu0 }
 0x103   : > { %v679_v60 = vadd.f32 %v435_v59, %v262_v58  ;;  %v632_v61 = vpop.f32.mrb[1].mxu0 }
 0x105   : > { %v440_v62 = vmax.f32 %v679_v60, 0.0 }
 0x107   : > { %442 = vst.msk [vmem:[%s168_s6] sm:$0xff] %vm441_vm4, %v440_v62 }
 0x108 PF: > { %s13_s12 = sadd.s32 1, %s699_s12  }
 0x109   : > { %p10_p4 = scmp.ge.s32.totalorder %s13_s12, 4  }
 0x10b   :  { %12 = sbr.rel (!%p10_p4) target bundleno = 1 (0x1), region = 64 }

// kernel: tile.63
= control target key start
LH: loop header
LB: loop body
LE: loop exit
PB: predicated region body
PF: predicated region fallthrough
CT: control target
= control target key end

     0   :  { %s22_s0 = inlined_call_operand.vmem [shape: f32[4], index: 0, kind: input, shape index: {}]   ;;  %s23_s1 = inlined_call_operand.vmem [shape: f32[8,4], index: 1, kind: output, shape index: {}]  }
   0x1   :  { %v4_v0 = vld [vmem:[%s22_s0] ss:$0 sm:$0xff] }
   0x2   :  { %5 = vst [vmem:[%s23_s1] sm:$0xff] %v4_v0 }

// kernel: tile.64
= control target key start
LH: loop header
LB: loop body
LE: loop exit
PB: predicated region body
PF: predicated region fallthrough
CT: control target
= control target key end

     0   :  { %s67_s10 = smov 28   ;;  %s68_s11 = smov 20   ;;  %vm3_vm0 = vcmask 31744   ;;  %vm9_vm1 = vcmask 261344   ;;  %vm15_vm2 = vcmask 228544   ;;  %vm21_vm3 = vcmask 195744   ;;  %s111_s0 = inlined_call_operand.vmem [shape: f32[8,4], index: 0, kind: input, shape index: {}]   ;;  %s112_s1 = inlined_call_operand.vmem [shape: f32[1,32], index: 1, kind: output, shape index: {}]  }
   0x1   :  { %v53_v0 = vld [vmem:[%s111_s0 + $0x7] sm:$0x1]   ;;  %v55_v1 = vld [vmem:[%s111_s0 + $0x5] sm:$0x1]   ;;  %v54_v2 = vld [vmem:[%s111_s0 + $0x6] sm:$0x1]  }
   0x2   :  { %7 = vrot.lane.b32.xlu0 %v53_v0, %s67_s10  ;;  %19 = vrot.lane.b32.xlu1 %v55_v1, %s68_s11  ;;  %v56_v3 = vld [vmem:[%s111_s0 + $0x4] sm:$0x1]   ;;  %v2_v4 = vld [vmem:[%s111_s0] sm:$0x1]   ;;  %s69_s18 = smov 24   ;;  %s70_s19 = smov 16  }
   0x3   :  { %4 = vst.msk [vmem:[#allocation0] sm:$0x1] %vm3_vm0, %v2_v4   ;;  %v57_v5 = vld [vmem:[%s111_s0 + $0x3] sm:$0x1]   ;;  %v58_v6 = vld [vmem:[%s111_s0 + $0x2] sm:$0x1]  }
   0x4   :  { %s71_s24 = smov 12   ;;  %s72_s25 = smov 8   ;;  %v59_v7 = vld [vmem:[%s111_s0 + $0x1] sm:$0x1]   ;;  %vm27_vm4 = vcmask 162944   ;;  %vm33_vm5 = vcmask 130144  }
   0x5   :  { %s73_s0 = smov 4   ;;  %vm39_vm6 = vcmask 97344   ;;  %vm45_vm7 = vcmask 64544  }
   0x6   :  { %13 = vrot.lane.b32.xlu0 %v54_v2, %s69_s18  ;;  %25 = vrot.lane.b32.xlu1 %v56_v3, %s70_s19 }
   0xa   :  { %31 = vrot.lane.b32.xlu0 %v57_v5, %s71_s24  ;;  %37 = vrot.lane.b32.xlu1 %v58_v6, %s72_s25 }
   0xe   :  { %43 = vrot.lane.b32.xlu0 %v59_v7, %s73_s0 }
  0x74   :  { %v8_v8 = vpop.permute.xlu0 %7   ;;  %v20_v9 = vpop.permute.xlu1 %19  }
  0x75   :  { %10 = vst.msk [vmem:[#allocation0] sm:$0x1] %vm9_vm1, %v8_v8  }
  0x78   :  { %v14_v10 = vpop.permute.xlu0 %13   ;;  %v26_v11 = vpop.permute.xlu1 %25  }
  0x79   :  { %16 = vst.msk [vmem:[#allocation0] sm:$0x1] %vm15_vm2, %v14_v10  }
  0x7a   :  { %22 = vst.msk [vmem:[#allocation0] sm:$0x1] %vm21_vm3, %v20_v9  }
  0x7b   :  { %28 = vst.msk [vmem:[#allocation0] sm:$0x1] %vm27_vm4, %v26_v11  }
  0x7c   :  { %v32_v12 = vpop.permute.xlu0 %31   ;;  %v38_v13 = vpop.permute.xlu1 %37  }
  0x7d   :  { %34 = vst.msk [vmem:[#allocation0] sm:$0x1] %vm33_vm5, %v32_v12  }
  0x7e   :  { %40 = vst.msk [vmem:[#allocation0] sm:$0x1] %vm39_vm6, %v38_v13  }
  0x80   :  { %v44_v14 = vpop.permute.xlu0 %43  }
  0x81   :  { %46 = vst.msk [vmem:[#allocation0] sm:$0x1] %vm45_vm7, %v44_v14  }
  0x88   :  { %v50_v15 = vld [vmem:[#allocation0] sm:$0x1] }
  0x89   :  { %52 = vst [vmem:[%s112_s1] sm:$0x1] %v50_v15 }

// kernel: sharednet_forward.12
= control target key start
LH: loop header
LB: loop body
LE: loop exit
PB: predicated region body
PF: predicated region fallthrough
CT: control target
= control target key end

     0   :  { %s724_s12 = smov 0   ;;  %s862_s0 = inlined_call_operand.vmem [shape: f32[2,10,80], index: 0, kind: input, shape index: {}]   ;;  %s863_s1 = inlined_call_operand.vmem [shape: f32[3,80,32], index: 1, kind: input, shape index: {}]   ;;  %s864_s2 = inlined_call_operand.vmem [shape: f32[1,32], index: 2, kind: input, shape index: {}]   ;;  %s865_s3 = inlined_call_operand.vmem [shape: f32[2,8,32], index: 3, kind: output, shape index: {}]  }
   0x1 LB: > { %s496_s13 = sadd.s32 4294967295, %s699_s12   ;;  %p500_p0 = scmp.ge.s32.totalorder %s699_s12, 1  ;;  %s699_s12 = sphi %s724_s12, %s13_s12  }
   0x2   : > { %p137_p1 = scmp.lt.s32.totalorder %s699_s12, 3 }
   0x4   : > { %p138_p2 = pnand %p500_p0, %p137_p1 }
   0x5   : > { %v506_v0 = vld [vmem:[%s863_s1 + $0x50] sm:$0xff] (!%p138_p2)  ;;  %v507_v1 = vld [vmem:[%s863_s1 + $0x58] sm:$0xff] (!%p138_p2)  ;;  %v508_v2 = vld [vmem:[%s863_s1 + $0x60] sm:$0xff] (!%p138_p2)  ;;  %v701_v3 = vmov (!%p138_p2), 0.0|0.0   ;;  %p160_p3 = scmp.lt.s32.totalorder (!%p138_p2), %s496_s13, 1  ;;  %vm702_vm0 = vmmov (!%p138_p2), 0  }
   0x6   : > { %141 = sbr.rel (%p138_p2) target bundleno = 264 (0x108), region = 32  ;;  %648 = vmatprep.subr.bf16.mxu0 (!%p138_p2), %v701_v3  ;;  %v649_v4 = vpack.c.bf16 (!%p138_p2), %v507_v1, %v506_v0  ;;  %v509_v5 = vld [vmem:[%s863_s1 + $0x68] sm:$0xff] (!%p138_p2)  ;;  %633 = vmatprep.subr.bf16.mxu1 (!%p138_p2), %v701_v3  ;;  %v703_v6 = vmov (!%p138_p2), 0.0   ;;  %v178_v8 = vld [vmem:[%s863_s1] sm:$0xff] (!%p138_p2)  ;;  %v510_v10 = vld [vmem:[%s863_s1 + $0x70] sm:$0xff] (!%p138_p2)  ;;  %vm275_vm1 = vcmask (!%p138_p2), 1046528  }
   0x7   : > { %607 = vmatprep.mubr.msk.f32.mxu0 (!%p138_p2), %vm702_vm0, %v703_v6  ;;  %584 = vmatprep.mubr.msk.f32.mxu1 (!%p138_p2), %vm702_vm0, %v703_v6  ;;  %v652_v7 = vpack.c.bf16 (!%p138_p2), %v509_v5, %v508_v2  ;;  %v179_v9 = vld [vmem:[%s863_s1 + $0x8] sm:$0xff] (!%p138_p2)  ;;  %v511_v11 = vld [vmem:[%s863_s1 + $0x78] sm:$0xff] (!%p138_p2)  ;;  %v180_v13 = vld [vmem:[%s863_s1 + $0x10] sm:$0xff] (!%p138_p2)  ;;  %vm188_vm2 = vcmask (!%p138_p2), 654336   ;;  %vm363_vm3 = vcmask (!%p138_p2), 1045504   ;;  %vm441_vm4 = vcmask (!%p138_p2), 261120  }
   0x8   : > { %650 = vmatpush3.bf16.msra.mxu0 (!%p138_p2), %v649_v4  ;;  %v634_v12 = vpack.c.bf16 (!%p138_p2), %v179_v9, %v178_v8  ;;  %v181_v14 = vld [vmem:[%s863_s1 + $0x18] sm:$0xff] (!%p138_p2)  ;;  %v655_v16 = vpack.c.bf16 (!%p138_p2), %v511_v11, %v510_v10  ;;  %v182_v17 = vld [vmem:[%s863_s1 + $0x20] sm:$0xff] (!%p138_p2)  ;;  %v183_v18 = vld [vmem:[%s863_s1 + $0x28] sm:$0xff] (!%p138_p2) }
   0x9   : > { %651 = vmatprep.subr.bf16.mxu0 (!%p138_p2), %v701_v3  ;;  %v637_v15 = vpack.c.bf16 (!%p138_p2), %v181_v14, %v180_v13  ;;  %v512_v19 = vld [vmem:[%s863_s1 + $0x80] sm:$0xff] (!%p138_p2)  ;;  %v513_v20 = vld [vmem:[%s863_s1 + $0x88] sm:$0xff] (!%p138_p2)  ;;  %v640_v21 = vpack.c.bf16 (!%p138_p2), %v183_v18, %v182_v17  ;;  %v514_v23 = vld [vmem:[%s863_s1 + $0x90] sm:$0xff] (!%p138_p2) }
   0xa   : > { %635 = vmatpush3.bf16.msra.mxu1 (!%p138_p2), %v634_v12  ;;  %v658_v22 = vpack.c.bf16 (!%p138_p2), %v513_v20, %v512_v19  ;;  %v184_v24 = vld [vmem:[%s863_s1 + $0x30] sm:$0xff] (!%p138_p2)  ;;  %v185_v25 = vld [vmem:[%s863_s1 + $0x38] sm:$0xff] (!%p138_p2)  ;;  %v186_v33 = vld [vmem:[%s863_s1 + $0x40] sm:$0xff] (!%p138_p2) }
   0xb   : > { %636 = vmatprep.subr.bf16.mxu1 (!%p138_p2), %v701_v3  ;;  %v515_v26 = vld [vmem:[%s863_s1 + $0x98] sm:$0xff] (!%p138_p2)  ;;  %v643_v29 = vpack.c.bf16 (!%p138_p2), %v185_v25, %v184_v24  ;;  %v187_v34 = vld [vmem:[%s863_s1 + $0x48] sm:$0xff] (!%p138_p2)  ;;  %v517_v35 = vld [vmem:[%s863_s1 + $0xa0] sm:$0xff] (!%p138_p2) }
   0xc   : > { %653 = vmatpush3.bf16.msra.mxu0 (!%p138_p2), %v652_v7  ;;  %v661_v30 = vpack.c.bf16 (!%p138_p2), %v515_v26, %v514_v23  ;;  %v518_v36 = vld [vmem:[%s863_s1 + $0xa8] sm:$0xff] (!%p138_p2)  ;;  %v646_v37 = vpack.c.bf16 (!%p138_p2), %v187_v34, %v186_v33  ;;  %v519_v40 = vld [vmem:[%s863_s1 + $0xb0] sm:$0xff] (!%p138_p2)  ;;  %v520_v41 = vld [vmem:[%s863_s1 + $0xb8] sm:$0xff] (!%p138_p2) }
   0xd   : > { %s867_s13 = smov (!%p160_p3, %s496_s13), 1  ;;  %654 = vmatprep.subr.bf16.mxu0 %v701_v3  ;;  %v664_v39 = vpack.c.bf16 %v518_v36, %v517_v35  ;;  %v667_v42 = vpack.c.bf16 %v520_v41, %v519_v40  ;;  %v521_v43 = vld [vmem:[%s863_s1 + $0xc0] sm:$0xff]  ;;  %v522_v44 = vld [vmem:[%s863_s1 + $0xc8] sm:$0xff]  ;;  %v523_v46 = vld [vmem:[%s863_s1 + $0xd0] sm:$0xff] }
   0xe   : > { %s530_s7 = sshll.u32 %s867_s13, 4  ;;  %638 = vmatpush3.bf16.msra.mxu1 %v637_v15  ;;  %v670_v45 = vpack.c.bf16 %v522_v44, %v521_v43  ;;  %v524_v47 = vld [vmem:[%s863_s1 + $0xd8] sm:$0xff]  ;;  %v525_v49 = vld [vmem:[%s863_s1 + $0xe0] sm:$0xff]  ;;  %v526_v50 = vld [vmem:[%s863_s1 + $0xe8] sm:$0xff]  ;;  %s503_s30 = sshll.u32 %s867_s13, 3 }
   0xf   : > { %s164_s20 = scalar_lea.vmem %s862_s0, %s530_s7  ;;  %639 = vmatprep.subr.bf16.mxu1 %v701_v3  ;;  %v673_v48 = vpack.c.bf16 %v524_v47, %v523_v46  ;;  %v676_v52 = vpack.c.bf16 %v526_v50, %v525_v49  ;;  %v504_v57 = vld [vmem:[%s864_s2] ss:$0 sm:$0xff]  ;;  %s168_s6 = scalar_lea.vmem %s865_s3, %s503_s30 }
  0x10   : > { %656 = vmatpush3.bf16.msra.mxu0 %v655_v16  ;;  %v169_v27 = vld [vmem:[%s164_s20] sm:$0xff]  ;;  %v170_v28 = vld [vmem:[%s164_s20 + $0x8] sm:$0x3] }
  0x11   : > { %657 = vmatprep.subr.bf16.mxu0 %v701_v3  ;;  %v276_v31 = vrot.slane %v169_v27, 1  ;;  %v277_v32 = vrot.slane %v170_v28, 1  ;;  %v365_v51 = vrot.slane %v170_v28, 2  ;;  %v364_v53 = vrot.slane %v169_v27, 2 }
  0x12   : > { %641 = vmatpush3.bf16.msra.mxu1 %v640_v21 }
  0x13   : > { %642 = vmatprep.subr.bf16.mxu1 %v701_v3  ;;  %v278_v38 = vsel %vm275_vm1, %v276_v31, %v277_v32  ;;  %v366_v54 = vsel %vm363_vm3, %v364_v53, %v365_v51 }
  0x14   : > { %659 = vmatpush3.bf16.msra.mxu0 %v658_v22 }
  0x15   : > { %660 = vmatprep.subr.bf16.mxu0 %v701_v3 }
  0x16   : > { %644 = vmatpush3.bf16.msra.mxu1 %v643_v29 }
  0x17   : > { %645 = vmatprep.subr.bf16.mxu1 %v701_v3 }
  0x18   : > { %662 = vmatpush3.bf16.msra.mxu0 %v661_v30 }
  0x19   : > { %663 = vmatprep.subr.bf16.mxu0 %v701_v3 }
  0x1a   : > { %647 = vmatpush3.bf16.msra.mxu1 %v646_v37 }
  0x1b   : > { %608 = vmatmul.mubr.msk.f32.vlgmr.msra.gmra.mrb[0].mxu0 %vm188_vm2, %v278_v38 }
  0x1c   : > { %665 = vmatpush3.bf16.msra.mxu0 %v664_v39  ;;  %630 = vmatprep.mubr.msk.f32.mxu0 %vm702_vm0, %v703_v6 }
  0x1d   : > { %666 = vmatprep.subr.bf16.mxu0 %v701_v3  ;;  %585 = vmatmul.mubr.msk.f32.vlgmr.msra.gmra.mrb[0].mxu1 %vm188_vm2, %v169_v27 }
  0x20   : > { %668 = vmatpush3.bf16.msra.mxu0 %v667_v42 }
  0x21   : > { %669 = vmatprep.subr.bf16.mxu0 %v701_v3 }
  0x24   : > { %671 = vmatpush3.bf16.msra.mxu0 %v670_v45 }
  0x25   : > { %672 = vmatprep.subr.bf16.mxu0 %v701_v3 }
  0x28   : > { %674 = vmatpush3.bf16.msra.mxu0 %v673_v48 }
  0x29   : > { %675 = vmatprep.subr.bf16.mxu0 %v701_v3 }
  0x2c   : > { %677 = vmatpush3.bf16.msra.mxu0 %v676_v52 }
  0x2f   : > { %631 = vmatmul.mubr.msk.f32.vlgmr.msra.gmra.mrb[0].mxu0 %vm188_vm2, %v366_v54 }
  0xf0   : > { %v258_v55 = vpop.f32.mrb[0].mxu1 }
  0xf1   : > { %v586_v56 = vpop.f32.mrb[1].mxu1  ;;  %v262_v58 = vadd.f32 %v504_v57, %v258_v55 }
 0x102   : > { %v435_v59 = vpop.f32.mrb[0].mxu0 }
 0x103   : > { %v679_v60 = vadd.f32 %v435_v59, %v262_v58  ;;  %v632_v61 = vpop.f32.mrb[1].mxu0 }
 0x105   : > { %v440_v62 = vmax.f32 %v679_v60, 0.0 }
 0x107   : > { %442 = vst.msk [vmem:[%s168_s6] sm:$0xff] %vm441_vm4, %v440_v62 }
 0x108 PF: > { %s13_s12 = sadd.s32 1, %s699_s12  }
 0x109   : > { %p10_p4 = scmp.ge.s32.totalorder %s13_s12, 4  }
 0x10b   :  { %12 = sbr.rel (!%p10_p4) target bundleno = 1 (0x1), region = 64 }

// kernel: sharednet_forward.13
= control target key start
LH: loop header
LB: loop body
LE: loop exit
PB: predicated region body
PF: predicated region fallthrough
CT: control target
= control target key end

     0   :  { %s627_s12 = smov 0   ;;  %s702_s0 = inlined_call_operand.vmem [shape: f32[2,10,40], index: 0, kind: input, shape index: {}]   ;;  %s703_s1 = inlined_call_operand.vmem [shape: f32[3,40,32], index: 1, kind: input, shape index: {}]   ;;  %s704_s2 = inlined_call_operand.vmem [shape: f32[1,32], index: 2, kind: input, shape index: {}]   ;;  %s705_s3 = inlined_call_operand.vmem [shape: f32[2,8,32], index: 3, kind: output, shape index: {}]  }
   0x1 LB: > { %s481_s13 = sadd.s32 4294967295, %s602_s12   ;;  %p485_p0 = scmp.ge.s32.totalorder %s602_s12, 1  ;;  %s602_s12 = sphi %s627_s12, %s13_s12  }
   0x2   : > { %p137_p1 = scmp.lt.s32.totalorder %s602_s12, 3 }
   0x4   : > { %p138_p2 = pnand %p485_p0, %p137_p1 }
   0x5   : > { %v491_v0 = vld [vmem:[%s703_s1 + $0x28] sm:$0xff] (!%p138_p2)  ;;  %v492_v1 = vld [vmem:[%s703_s1 + $0x30] sm:$0xff] (!%p138_p2)  ;;  %v493_v2 = vld [vmem:[%s703_s1 + $0x38] sm:$0xff] (!%p138_p2)  ;;  %v604_v3 = vmov (!%p138_p2), 0.0|0.0   ;;  %p160_p3 = scmp.lt.s32.totalorder (!%p138_p2), %s481_s13, 1  ;;  %vm605_vm0 = vmmov (!%p138_p2), 0  }
   0x6   : > { %141 = sbr.rel (%p138_p2) target bundleno = 247 (0xf7), region = 32  ;;  %569 = vmatprep.subr.bf16.mxu0 (!%p138_p2), %v604_v3  ;;  %v570_v4 = vpack.c.bf16 (!%p138_p2), %v492_v1, %v491_v0  ;;  %v494_v5 = vld [vmem:[%s703_s1 + $0x40] sm:$0xff] (!%p138_p2)  ;;  %563 = vmatprep.subr.bf16.mxu1 (!%p138_p2), %v604_v3  ;;  %v179_v7 = vld [vmem:[%s703_s1 + $0x8] sm:$0xff] (!%p138_p2)  ;;  %v606_v9 = vmov (!%p138_p2), 0.0   ;;  %v180_v11 = vld [vmem:[%s703_s1 + $0x10] sm:$0xff] (!%p138_p2)  ;;  %vm265_vm1 = vcmask (!%p138_p2), 1046528  }
   0x7   : > { %v178_v6 = vld [vmem:[%s703_s1] sm:$0xff] (!%p138_p2)  ;;  %547 = vmatprep.mubr.msk.f32.mxu0 (!%p138_p2), %vm605_vm0, %v606_v9  ;;  %534 = vmatprep.mubr.msk.f32.mxu1 (!%p138_p2), %vm605_vm0, %v606_v9  ;;  %v573_v10 = vpack.c.bf16 (!%p138_p2), %v494_v5, %v493_v2  ;;  %v181_v12 = vld [vmem:[%s703_s1 + $0x18] sm:$0xff] (!%p138_p2)  ;;  %v497_v14 = vld [vmem:[%s703_s1 + $0x50] sm:$0xff] (!%p138_p2)  ;;  %vm183_vm2 = vcmask (!%p138_p2), 326656   ;;  %vm348_vm3 = vcmask (!%p138_p2), 1045504   ;;  %vm426_vm4 = vcmask (!%p138_p2), 261120  }
   0x8   : > { %v564_v8 = vpack.c.bf16 (!%p138_p2), %v179_v7, %v178_v6  ;;  %571 = vmatpush3.bf16.msra.mxu0 (!%p138_p2), %v570_v4  ;;  %v567_v13 = vpack.c.bf16 (!%p138_p2), %v181_v12, %v180_v11  ;;  %v498_v15 = vld [vmem:[%s703_s1 + $0x58] sm:$0xff] (!%p138_p2)  ;;  %v495_v18 = vld [vmem:[%s703_s1 + $0x48] sm:$0xff] (!%p138_p2)  ;;  %v499_v23 = vld [vmem:[%s703_s1 + $0x60] sm:$0xff] (!%p138_p2) }
   0x9   : > { %572 = vmatprep.subr.bf16.mxu0 (!%p138_p2), %v604_v3  ;;  %v576_v21 = vpack.c.bf16 (!%p138_p2), %v498_v15, %v497_v14  ;;  %v500_v24 = vld [vmem:[%s703_s1 + $0x68] sm:$0xff] (!%p138_p2)  ;;  %v182_v25 = vld [vmem:[%s703_s1 + $0x20] sm:$0xff] (!%p138_p2)  ;;  %v501_v29 = vld [vmem:[%s703_s1 + $0x70] sm:$0xff] (!%p138_p2) }
   0xa   : > { %565 = vmatpush3.bf16.msra.mxu1 (!%p138_p2), %v564_v8  ;;  %v579_v26 = vpack.c.bf16 (!%p138_p2), %v500_v24, %v499_v23  ;;  %v489_v33 = vld [vmem:[%s704_s2] ss:$0 sm:$0xff] (!%p138_p2) }
   0xb   : > { %566 = vmatprep.subr.bf16.mxu1 (!%p138_p2), %v604_v3 }
   0xc   : > { %574 = vmatpush3.bf16.msra.mxu0 (!%p138_p2), %v573_v10 }
   0xd   : > { %s707_s13 = smov (!%p160_p3, %s481_s13), 1  ;;  %545 = vmatprep.subr.mxu0 %v606_v9 }
   0xe   : > { %s505_s30 = sshll.u32 %s707_s13, 4  ;;  %568 = vmatpush3.bf16.msra.mxu1 %v567_v13  ;;  %s488_s25 = sshll.u32 %s707_s13, 3 }
   0xf   : > { %s164_s6 = scalar_lea.vmem %s702_s0, %s505_s30  ;;  %532 = vmatprep.subr.mxu1 %v606_v9  ;;  %s168_s28 = scalar_lea.vmem %s705_s3, %s488_s25 }
  0x10   : > { %v169_v16 = vld [vmem:[%s164_s6] sm:$0xff]  ;;  %v170_v17 = vld [vmem:[%s164_s6 + $0x8] sm:$0x3]  ;;  %546 = vmatpush3.msra.mxu0 %v495_v18 }
  0x11   : > { %v266_v19 = vrot.slane %v169_v16, 1  ;;  %v267_v20 = vrot.slane %v170_v17, 1  ;;  %575 = vmatprep.subr.bf16.mxu0 %v604_v3  ;;  %v350_v27 = vrot.slane %v170_v17, 2  ;;  %v349_v28 = vrot.slane %v169_v16, 2 }
  0x12   : > { %533 = vmatpush3.msra.mxu1 %v182_v25 }
  0x13   : > { %v268_v22 = vsel %vm265_vm1, %v266_v19, %v267_v20  ;;  %535 = vmatmul.mubr.msk.f32.vlgmr.msra.gmra.mrb[0].mxu1 %vm183_vm2, %v169_v16  ;;  %v351_v30 = vsel %vm348_vm3, %v349_v28, %v350_v27 }
  0x14   : > { %548 = vmatmul.mubr.msk.f32.vlgmr.msra.gmra.mrb[0].mxu0 %vm183_vm2, %v268_v22 }
  0x15   : > { %577 = vmatpush3.bf16.msra.mxu0 %v576_v21  ;;  %560 = vmatprep.mubr.msk.f32.mxu0 %vm605_vm0, %v606_v9 }
  0x16   : > { %578 = vmatprep.subr.bf16.mxu0 %v604_v3 }
  0x19   : > { %580 = vmatpush3.bf16.msra.mxu0 %v579_v26 }
  0x1a   : > { %558 = vmatprep.subr.mxu0 %v606_v9 }
  0x1d   : > { %559 = vmatpush3.msra.mxu0 %v501_v29 }
  0x1e   : > { %561 = vmatmul.mubr.msk.f32.vlgmr.msra.gmra.mrb[0].mxu0 %vm183_vm2, %v351_v30 }
  0xe6   : > { %v253_v31 = vpop.f32.mrb[0].mxu1 }
  0xe7   : > { %v536_v32 = vpop.f32.mrb[1].mxu1  ;;  %v257_v34 = vadd.f32 %v489_v33, %v253_v31 }
  0xf1   : > { %v420_v35 = vpop.f32.mrb[0].mxu0 }
  0xf2   : > { %v582_v36 = vadd.f32 %v420_v35, %v257_v34  ;;  %v562_v37 = vpop.f32.mrb[1].mxu0 }
  0xf4   : > { %v425_v38 = vmax.f32 %v582_v36, 0.0 }
  0xf6   : > { %427 = vst.msk [vmem:[%s168_s28] sm:$0xff] %vm426_vm4, %v425_v38 }
  0xf7 PF: > { %s13_s12 = sadd.s32 1, %s602_s12  }
  0xf8   : > { %p10_p4 = scmp.ge.s32.totalorder %s13_s12, 4  }
  0xfa   :  { %12 = sbr.rel (!%p10_p4) target bundleno = 1 (0x1), region = 64 }

</bundles_post_ra>
